<compile_context>
chip_gen: v5e
topology: v5e:2x2
jax: 0.10.0
libtpu: 0.0.40
codegen_flags: <defaults>
</compile_context>

<pallas_src>
import functools

import jax
import jax.numpy as jnp
from jax.experimental import pallas as pl
from jax.experimental.pallas import tpu as pltpu


def _round_up(a, b):
    return ((a + b - 1) // b) * b


def _attention_kernel(x_ref, bd_ref, cw_ref, bbc_ref, fold_ref, o_ref, *,
                      num_parts, tokens_dim, matmul_dtype):
    """One grid step.

    x_ref:    (QB, num_parts * WH)   each row = `num_parts` batch elements, each a
                                     flattened (W, H) token block of WH lanes.
    bd_ref:   (WH, WH)   blockdiag(W_attn.T x W)
    cw_ref:   (WH, W)    blockdiag(w_comb column x W)     -> logits
    bbc_ref:  (W, WH)    blockdiag(ones(1, H) x W)        -> broadcast attw over H lanes
    fold_ref: (num_parts*WH, num_parts*H)  token-fold + output packing matrix
    o_ref:    (QB, num_parts * H) = (QB, 128)  lane-dense packed output
    """
    wh = tokens_dim
    f32 = jnp.float32

    acc = None
    for b in range(num_parts):                       # 4 statically-unrolled parts
        xb = x_ref[:, b * wh:(b + 1) * wh]           # (QB, WH), vreg-aligned slice
        xb_f32 = xb.astype(f32)

        # ---- linear layer, packed: one MXU matmul for all W tokens ------------
        wplus = jnp.tanh(
            jnp.dot(xb.astype(matmul_dtype), bd_ref[...],
                    preferred_element_type=f32))      # (QB, WH) f32, full lane density

        # ---- logits: per-token dot with w_comb via packed projection ----------
        logits = jnp.dot(wplus.astype(matmul_dtype), cw_ref[...],
                         preferred_element_type=f32)  # (QB, W)

        # ---- exact, numerically stable softmax over the W tokens --------------
        logits = logits - jnp.max(logits, axis=-1, keepdims=True)
        e = jnp.exp(logits)                           # only W exps per batch element
        attw = e / jnp.sum(e, axis=-1, keepdims=True)  # exact divide (mem-bound)

        # ---- broadcast attw back to the packed (W*H) lane layout --------------
        attw_b = jnp.dot(attw.astype(matmul_dtype), bbc_ref[...],
                         preferred_element_type=f32)  # (QB, WH)

        # ---- weighted average over tokens, folded straight into the packed ----
        # ---- (QB, 128) output layout via the fold matrix -----------------------
        weighted = attw_b * xb_f32                    # (QB, WH) f32, VPU full density
        part = jnp.dot(weighted.astype(matmul_dtype),
                       fold_ref[b * wh:(b + 1) * wh, :],
                       preferred_element_type=f32)    # (QB, num_parts*H), nonzero in group b
        acc = part if acc is None else acc + part

    o_ref[...] = acc.astype(o_ref.dtype)              # lane-dense 128-wide store


def attention_forward(x, w_attn, w_comb, *, block_batch=2048, matmul_dtype=None,
                      vmem_limit_bytes=40 * 1024 * 1024):
    """Additive attention forward.

    x:      (N, W, H) float32 or bfloat16
    w_attn: (H, H) = nn.Linear(dim, dim, bias=False).weight   (out, in) layout
    w_comb: (1, H) = nn.Linear(dim, 1, bias=False).weight
    Returns (N, H).

    Performance knobs:
      * To actually cut HBM traffic pass x already as bfloat16 (casting inside the
        kernel does not save DMA bytes).
      * matmul_dtype=jnp.bfloat16 runs the MXU in bf16 (f32 accumulate) while all
        element-wise math stays f32 (recommended on v5e).
      * block_batch (batch elements per grid step) and vmem_limit_bytes are sized for
        v7x's 64 MiB/TC by default; on v5e/v6e (128 MiB VMEM) block_batch can be
        raised to 4096-8192 with a higher limit.
    """
    n, w, h = x.shape
    out_dtype = x.dtype
    if matmul_dtype is None:
        matmul_dtype = x.dtype

    assert h <= 128 and 128 % h == 0, (
        "TODO(synk): general H needs a padded lane packing; got H=%d" % h)
    row_pack = 128 // h                      # batch elements packed per 128-lane row
    wh = w * h
    assert wh % 128 == 0, (
        "TODO(synk): pad W*H to a multiple of 128 for unaligned token layouts")

    # ---- block size (in batch elements) + pad N to a multiple of it ------------
    granule = 8 * row_pack                   # keeps packed rows in sublane groups of 8
    blk = min(block_batch, _round_up(n, granule))
    blk = _round_up(blk, granule)
    n_pad = _round_up(n, blk)

    x2 = x.reshape(n, wh)                    # free row-major reshape, lane-dense
    if n_pad != n:
        # Zero rows give a uniform softmax and a zero output; sliced off below.
        # TODO(synk): a masked tail block would avoid this pad copy for huge N.
        x2 = jnp.pad(x2, ((0, n_pad - n), (0, 0)))
    xp = x2.reshape(n_pad // row_pack, row_pack * wh)   # 4 batch elements per row

    # ---- packed weights (built once per call, constant index_map in the grid) --
    f32 = jnp.float32
    eye_w = jnp.eye(w, dtype=f32)
    bd = jnp.kron(eye_w, w_attn.astype(f32).T).astype(matmul_dtype)           # (WH, WH)
    cw = jnp.kron(eye_w, w_comb.astype(f32).reshape(h, 1)).astype(matmul_dtype)  # (WH, W)
    bbc = jnp.kron(eye_w, jnp.ones((1, h), f32)).astype(matmul_dtype)         # (W, WH)
    fold = jnp.kron(
        jnp.eye(row_pack, dtype=f32),
        jnp.kron(jnp.ones((w, 1), f32), jnp.eye(h, dtype=f32)),
    ).astype(matmul_dtype)                                                    # (row_pack*WH, 128)

    qb = blk // row_pack
    grid = (n_pad // blk,)

    kernel = functools.partial(
        _attention_kernel,
        num_parts=row_pack, tokens_dim=wh, matmul_dtype=matmul_dtype)

    out_packed = pl.pallas_call(
        kernel,
        out_shape=jax.ShapeDtypeStruct((n_pad // row_pack, row_pack * h), out_dtype),
        grid_spec=pltpu.PrefetchScalarGridSpec(
            num_scalar_prefetch=0,
            grid=grid,
            in_specs=[
                # x: lane-dense (QB, 4*W*H) block, multi-MiB per step, double-buffered.
                pl.BlockSpec((qb, row_pack * wh), lambda i: (i, 0)),
                # Packed weights: constant block index -> fetched once, never re-DMA'd.
                pl.BlockSpec(bd.shape, lambda i: (0, 0)),
                pl.BlockSpec(cw.shape, lambda i: (0, 0)),
                pl.BlockSpec(bbc.shape, lambda i: (0, 0)),
                pl.BlockSpec(fold.shape, lambda i: (0, 0)),
            ],
            # Output: lane-dense (QB, 128) tiles -> unmasked vst + dense writeback DMA.
            out_specs=pl.BlockSpec((qb, row_pack * h), lambda i: (i, 0)),
        ),
        compiler_params=pltpu.CompilerParams(
            # Batch axis is independent -> shards across TensorCores on v7x.
            dimension_semantics=("parallel",),
            vmem_limit_bytes=vmem_limit_bytes,
        ),
    )(xp, bd, cw, bbc, fold)

    # (N_pad/4, 128) -> (N_pad, H) is a free row-major reshape; drop padded rows.
    return out_packed.reshape(n_pad, h)[:n]


def _reference(x, w_attn, w_comb):
    hp = jax.lax.Precision.HIGHEST
    wplus = jnp.tanh(jnp.einsum("nwh,oh->nwo", x, w_attn, precision=hp))
    logits = jnp.einsum("nwh,oh->nwo", wplus, w_comb, precision=hp)[..., 0]  # (N, W)
    attw = jax.nn.softmax(logits, axis=1)
    return jnp.einsum("nw,nwh->nh", attw, x, precision=hp)


if __name__ == "__main__":
    key = jax.random.PRNGKey(0)
    k_x, k_w1, k_w2 = jax.random.split(key, 3)

    N, W, H = 2, 8, 32          # batch, tokens, hidden (dim=32)

    x = jax.random.normal(k_x, (N, W, H), dtype=jnp.float32)

    # Deterministic params mimicking nn.Linear default init (uniform +/- 1/sqrt(fan_in)),
    # attn_bias=False so no bias terms.
    bound = 1.0 / jnp.sqrt(jnp.float32(H))
    w_attn = jax.random.uniform(k_w1, (H, H), jnp.float32, -bound, bound)  # Linear(dim, dim).weight
    w_comb = jax.random.uniform(k_w2, (1, H), jnp.float32, -bound, bound)  # Linear(dim, 1).weight

    out = attention_forward(x, w_attn, w_comb)
    out = jax.block_until_ready(out)
    ref = _reference(x, w_attn, w_comb)
    assert out.shape == (N, H)
    assert jnp.allclose(out, ref, atol=2e-3, rtol=2e-3), (
        f"max abs err {jnp.max(jnp.abs(out - ref))}")

    # Second check: awkward N (padding path) + multi-step grid + small block.
    N2 = 70
    x2 = jax.random.normal(jax.random.PRNGKey(1), (N2, W, H), dtype=jnp.float32)
    out2 = attention_forward(x2, w_attn, w_comb, block_batch=32)
    out2 = jax.block_until_ready(out2)
    ref2 = _reference(x2, w_attn, w_comb)
    assert out2.shape == (N2, H)
    assert jnp.allclose(out2, ref2, atol=2e-3, rtol=2e-3), (
        f"max abs err {jnp.max(jnp.abs(out2 - ref2))}")

    print("KERNEL_OK")
</pallas_src>

<mosaic_0001>
module attributes {stable_mosaic.version = 11 : i64} {
  func.func @_attention_kernel(%arg0: i32, %arg1: memref<8x1024xf32, #tpu.memory_space<vmem>>, %arg2: memref<256x256xf32, #tpu.memory_space<vmem>>, %arg3: memref<256x8xf32, #tpu.memory_space<vmem>>, %arg4: memref<8x256xf32, #tpu.memory_space<vmem>>, %arg5: memref<1024x128xf32, #tpu.memory_space<vmem>>, %arg6: memref<8x128xf32, #tpu.memory_space<vmem>>) attributes {dimension_semantics = [#tpu.dimension_semantics<parallel>], iteration_bounds = array<i64: 1>, scalar_prefetch = 0 : i64, scratch_operands = 0 : i64, tpu.core_type = #tpu.core_type<tc>, window_params = [{transform_indices = @transform_0, window_bounds = array<i64: 8, 1024>}, {pipeline_mode = #tpu.pipeline_mode<synchronous>, transform_indices = @transform_1, window_bounds = array<i64: 256, 256>}, {pipeline_mode = #tpu.pipeline_mode<synchronous>, transform_indices = @transform_2, window_bounds = array<i64: 256, 8>}, {pipeline_mode = #tpu.pipeline_mode<synchronous>, transform_indices = @transform_3, window_bounds = array<i64: 8, 256>}, {pipeline_mode = #tpu.pipeline_mode<synchronous>, transform_indices = @transform_4, window_bounds = array<i64: 1024, 128>}, {transform_indices = @transform_5, window_bounds = array<i64: 8, 128>}]} {
    %c0 = arith.constant 0 : index
    %c0_0 = arith.constant 0 : index
    %0 = vector.load %arg1[%c0, %c0_0] : memref<8x1024xf32, #tpu.memory_space<vmem>>, vector<8x256xf32>
    %c0_1 = arith.constant 0 : index
    %c0_2 = arith.constant 0 : index
    %1 = vector.load %arg2[%c0_1, %c0_2] : memref<256x256xf32, #tpu.memory_space<vmem>>, vector<256x256xf32>
    %cst = arith.constant dense<0.000000e+00> : vector<8x256xf32>
    %2 = tpu.matmul %0, %1, %cst {dimension_numbers = #tpu.dot_dimension_numbers<[1], [0], [0], [1], [0, 0, 1, 1], [], []>} : vector<8x256xf32>, vector<256x256xf32>, vector<8x256xf32> -> vector<8x256xf32>
    %3 = math.tanh %2 : vector<8x256xf32>
    %c0_3 = arith.constant 0 : index
    %c0_4 = arith.constant 0 : index
    %4 = vector.load %arg3[%c0_3, %c0_4] : memref<256x8xf32, #tpu.memory_space<vmem>>, vector<256x8xf32>
    %cst_5 = arith.constant dense<0.000000e+00> : vector<8x8xf32>
    %5 = tpu.matmul %3, %4, %cst_5 {dimension_numbers = #tpu.dot_dimension_numbers<[1], [0], [0], [1], [0, 0, 1, 1], [], []>} : vector<8x256xf32>, vector<256x8xf32>, vector<8x8xf32> -> vector<8x8xf32>
    %cst_6 = arith.constant dense<0xFF800000> : vector<8xf32>
    %6 = vector.multi_reduction <maximumf>, %5, %cst_6 [1] : vector<8x8xf32> to vector<8xf32>
    %7 = vector.shape_cast %6 : vector<8xf32> to vector<8x1xf32>
    %8 = vector.broadcast %7 : vector<8x1xf32> to vector<8x8xf32>
    %9 = arith.subf %5, %8 : vector<8x8xf32>
    %10 = math.exp %9 : vector<8x8xf32>
    %cst_7 = arith.constant dense<0.000000e+00> : vector<8xf32>
    %11 = vector.multi_reduction <add>, %10, %cst_7 [1] : vector<8x8xf32> to vector<8xf32>
    %12 = vector.shape_cast %11 : vector<8xf32> to vector<8x1xf32>
    %13 = vector.broadcast %12 : vector<8x1xf32> to vector<8x8xf32>
    %14 = arith.divf %10, %13 : vector<8x8xf32>
    %c0_8 = arith.constant 0 : index
    %c0_9 = arith.constant 0 : index
    %15 = vector.load %arg4[%c0_8, %c0_9] : memref<8x256xf32, #tpu.memory_space<vmem>>, vector<8x256xf32>
    %cst_10 = arith.constant dense<0.000000e+00> : vector<8x256xf32>
    %16 = tpu.matmul %14, %15, %cst_10 {dimension_numbers = #tpu.dot_dimension_numbers<[1], [0], [0], [1], [0, 0, 1, 1], [], []>} : vector<8x8xf32>, vector<8x256xf32>, vector<8x256xf32> -> vector<8x256xf32>
    %17 = arith.mulf %16, %0 : vector<8x256xf32>
    %c0_11 = arith.constant 0 : index
    %c0_12 = arith.constant 0 : index
    %18 = vector.load %arg5[%c0_11, %c0_12] : memref<1024x128xf32, #tpu.memory_space<vmem>>, vector<256x128xf32>
    %cst_13 = arith.constant dense<0.000000e+00> : vector<8x128xf32>
    %19 = tpu.matmul %17, %18, %cst_13 {dimension_numbers = #tpu.dot_dimension_numbers<[1], [0], [0], [1], [0, 0, 1, 1], [], []>} : vector<8x256xf32>, vector<256x128xf32>, vector<8x128xf32> -> vector<8x128xf32>
    %c0_14 = arith.constant 0 : index
    %c256 = arith.constant 256 : index
    %20 = vector.load %arg1[%c0_14, %c256] : memref<8x1024xf32, #tpu.memory_space<vmem>>, vector<8x256xf32>
    %c0_15 = arith.constant 0 : index
    %c0_16 = arith.constant 0 : index
    %21 = vector.load %arg2[%c0_15, %c0_16] : memref<256x256xf32, #tpu.memory_space<vmem>>, vector<256x256xf32>
    %cst_17 = arith.constant dense<0.000000e+00> : vector<8x256xf32>
    %22 = tpu.matmul %20, %21, %cst_17 {dimension_numbers = #tpu.dot_dimension_numbers<[1], [0], [0], [1], [0, 0, 1, 1], [], []>} : vector<8x256xf32>, vector<256x256xf32>, vector<8x256xf32> -> vector<8x256xf32>
    %23 = math.tanh %22 : vector<8x256xf32>
    %c0_18 = arith.constant 0 : index
    %c0_19 = arith.constant 0 : index
    %24 = vector.load %arg3[%c0_18, %c0_19] : memref<256x8xf32, #tpu.memory_space<vmem>>, vector<256x8xf32>
    %cst_20 = arith.constant dense<0.000000e+00> : vector<8x8xf32>
    %25 = tpu.matmul %23, %24, %cst_20 {dimension_numbers = #tpu.dot_dimension_numbers<[1], [0], [0], [1], [0, 0, 1, 1], [], []>} : vector<8x256xf32>, vector<256x8xf32>, vector<8x8xf32> -> vector<8x8xf32>
    %cst_21 = arith.constant dense<0xFF800000> : vector<8xf32>
    %26 = vector.multi_reduction <maximumf>, %25, %cst_21 [1] : vector<8x8xf32> to vector<8xf32>
    %27 = vector.shape_cast %26 : vector<8xf32> to vector<8x1xf32>
    %28 = vector.broadcast %27 : vector<8x1xf32> to vector<8x8xf32>
    %29 = arith.subf %25, %28 : vector<8x8xf32>
    %30 = math.exp %29 : vector<8x8xf32>
    %cst_22 = arith.constant dense<0.000000e+00> : vector<8xf32>
    %31 = vector.multi_reduction <add>, %30, %cst_22 [1] : vector<8x8xf32> to vector<8xf32>
    %32 = vector.shape_cast %31 : vector<8xf32> to vector<8x1xf32>
    %33 = vector.broadcast %32 : vector<8x1xf32> to vector<8x8xf32>
    %34 = arith.divf %30, %33 : vector<8x8xf32>
    %c0_23 = arith.constant 0 : index
    %c0_24 = arith.constant 0 : index
    %35 = vector.load %arg4[%c0_23, %c0_24] : memref<8x256xf32, #tpu.memory_space<vmem>>, vector<8x256xf32>
    %cst_25 = arith.constant dense<0.000000e+00> : vector<8x256xf32>
    %36 = tpu.matmul %34, %35, %cst_25 {dimension_numbers = #tpu.dot_dimension_numbers<[1], [0], [0], [1], [0, 0, 1, 1], [], []>} : vector<8x8xf32>, vector<8x256xf32>, vector<8x256xf32> -> vector<8x256xf32>
    %37 = arith.mulf %36, %20 : vector<8x256xf32>
    %c256_26 = arith.constant 256 : index
    %c0_27 = arith.constant 0 : index
    %38 = vector.load %arg5[%c256_26, %c0_27] : memref<1024x128xf32, #tpu.memory_space<vmem>>, vector<256x128xf32>
    %cst_28 = arith.constant dense<0.000000e+00> : vector<8x128xf32>
    %39 = tpu.matmul %37, %38, %cst_28 {dimension_numbers = #tpu.dot_dimension_numbers<[1], [0], [0], [1], [0, 0, 1, 1], [], []>} : vector<8x256xf32>, vector<256x128xf32>, vector<8x128xf32> -> vector<8x128xf32>
    %40 = arith.addf %19, %39 : vector<8x128xf32>
    %c0_29 = arith.constant 0 : index
    %c512 = arith.constant 512 : index
    %41 = vector.load %arg1[%c0_29, %c512] : memref<8x1024xf32, #tpu.memory_space<vmem>>, vector<8x256xf32>
    %c0_30 = arith.constant 0 : index
    %c0_31 = arith.constant 0 : index
    %42 = vector.load %arg2[%c0_30, %c0_31] : memref<256x256xf32, #tpu.memory_space<vmem>>, vector<256x256xf32>
    %cst_32 = arith.constant dense<0.000000e+00> : vector<8x256xf32>
    %43 = tpu.matmul %41, %42, %cst_32 {dimension_numbers = #tpu.dot_dimension_numbers<[1], [0], [0], [1], [0, 0, 1, 1], [], []>} : vector<8x256xf32>, vector<256x256xf32>, vector<8x256xf32> -> vector<8x256xf32>
    %44 = math.tanh %43 : vector<8x256xf32>
    %c0_33 = arith.constant 0 : index
    %c0_34 = arith.constant 0 : index
    %45 = vector.load %arg3[%c0_33, %c0_34] : memref<256x8xf32, #tpu.memory_space<vmem>>, vector<256x8xf32>
    %cst_35 = arith.constant dense<0.000000e+00> : vector<8x8xf32>
    %46 = tpu.matmul %44, %45, %cst_35 {dimension_numbers = #tpu.dot_dimension_numbers<[1], [0], [0], [1], [0, 0, 1, 1], [], []>} : vector<8x256xf32>, vector<256x8xf32>, vector<8x8xf32> -> vector<8x8xf32>
    %cst_36 = arith.constant dense<0xFF800000> : vector<8xf32>
    %47 = vector.multi_reduction <maximumf>, %46, %cst_36 [1] : vector<8x8xf32> to vector<8xf32>
    %48 = vector.shape_cast %47 : vector<8xf32> to vector<8x1xf32>
    %49 = vector.broadcast %48 : vector<8x1xf32> to vector<8x8xf32>
    %50 = arith.subf %46, %49 : vector<8x8xf32>
    %51 = math.exp %50 : vector<8x8xf32>
    %cst_37 = arith.constant dense<0.000000e+00> : vector<8xf32>
    %52 = vector.multi_reduction <add>, %51, %cst_37 [1] : vector<8x8xf32> to vector<8xf32>
    %53 = vector.shape_cast %52 : vector<8xf32> to vector<8x1xf32>
    %54 = vector.broadcast %53 : vector<8x1xf32> to vector<8x8xf32>
    %55 = arith.divf %51, %54 : vector<8x8xf32>
    %c0_38 = arith.constant 0 : index
    %c0_39 = arith.constant 0 : index
    %56 = vector.load %arg4[%c0_38, %c0_39] : memref<8x256xf32, #tpu.memory_space<vmem>>, vector<8x256xf32>
    %cst_40 = arith.constant dense<0.000000e+00> : vector<8x256xf32>
    %57 = tpu.matmul %55, %56, %cst_40 {dimension_numbers = #tpu.dot_dimension_numbers<[1], [0], [0], [1], [0, 0, 1, 1], [], []>} : vector<8x8xf32>, vector<8x256xf32>, vector<8x256xf32> -> vector<8x256xf32>
    %58 = arith.mulf %57, %41 : vector<8x256xf32>
    %c512_41 = arith.constant 512 : index
    %c0_42 = arith.constant 0 : index
    %59 = vector.load %arg5[%c512_41, %c0_42] : memref<1024x128xf32, #tpu.memory_space<vmem>>, vector<256x128xf32>
    %cst_43 = arith.constant dense<0.000000e+00> : vector<8x128xf32>
    %60 = tpu.matmul %58, %59, %cst_43 {dimension_numbers = #tpu.dot_dimension_numbers<[1], [0], [0], [1], [0, 0, 1, 1], [], []>} : vector<8x256xf32>, vector<256x128xf32>, vector<8x128xf32> -> vector<8x128xf32>
    %61 = arith.addf %40, %60 : vector<8x128xf32>
    %c0_44 = arith.constant 0 : index
    %c768 = arith.constant 768 : index
    %62 = vector.load %arg1[%c0_44, %c768] : memref<8x1024xf32, #tpu.memory_space<vmem>>, vector<8x256xf32>
    %c0_45 = arith.constant 0 : index
    %c0_46 = arith.constant 0 : index
    %63 = vector.load %arg2[%c0_45, %c0_46] : memref<256x256xf32, #tpu.memory_space<vmem>>, vector<256x256xf32>
    %cst_47 = arith.constant dense<0.000000e+00> : vector<8x256xf32>
    %64 = tpu.matmul %62, %63, %cst_47 {dimension_numbers = #tpu.dot_dimension_numbers<[1], [0], [0], [1], [0, 0, 1, 1], [], []>} : vector<8x256xf32>, vector<256x256xf32>, vector<8x256xf32> -> vector<8x256xf32>
    %65 = math.tanh %64 : vector<8x256xf32>
    %c0_48 = arith.constant 0 : index
    %c0_49 = arith.constant 0 : index
    %66 = vector.load %arg3[%c0_48, %c0_49] : memref<256x8xf32, #tpu.memory_space<vmem>>, vector<256x8xf32>
    %cst_50 = arith.constant dense<0.000000e+00> : vector<8x8xf32>
    %67 = tpu.matmul %65, %66, %cst_50 {dimension_numbers = #tpu.dot_dimension_numbers<[1], [0], [0], [1], [0, 0, 1, 1], [], []>} : vector<8x256xf32>, vector<256x8xf32>, vector<8x8xf32> -> vector<8x8xf32>
    %cst_51 = arith.constant dense<0xFF800000> : vector<8xf32>
    %68 = vector.multi_reduction <maximumf>, %67, %cst_51 [1] : vector<8x8xf32> to vector<8xf32>
    %69 = vector.shape_cast %68 : vector<8xf32> to vector<8x1xf32>
    %70 = vector.broadcast %69 : vector<8x1xf32> to vector<8x8xf32>
    %71 = arith.subf %67, %70 : vector<8x8xf32>
    %72 = math.exp %71 : vector<8x8xf32>
    %cst_52 = arith.constant dense<0.000000e+00> : vector<8xf32>
    %73 = vector.multi_reduction <add>, %72, %cst_52 [1] : vector<8x8xf32> to vector<8xf32>
    %74 = vector.shape_cast %73 : vector<8xf32> to vector<8x1xf32>
    %75 = vector.broadcast %74 : vector<8x1xf32> to vector<8x8xf32>
    %76 = arith.divf %72, %75 : vector<8x8xf32>
    %c0_53 = arith.constant 0 : index
    %c0_54 = arith.constant 0 : index
    %77 = vector.load %arg4[%c0_53, %c0_54] : memref<8x256xf32, #tpu.memory_space<vmem>>, vector<8x256xf32>
    %cst_55 = arith.constant dense<0.000000e+00> : vector<8x256xf32>
    %78 = tpu.matmul %76, %77, %cst_55 {dimension_numbers = #tpu.dot_dimension_numbers<[1], [0], [0], [1], [0, 0, 1, 1], [], []>} : vector<8x8xf32>, vector<8x256xf32>, vector<8x256xf32> -> vector<8x256xf32>
    %79 = arith.mulf %78, %62 : vector<8x256xf32>
    %c768_56 = arith.constant 768 : index
    %c0_57 = arith.constant 0 : index
    %80 = vector.load %arg5[%c768_56, %c0_57] : memref<1024x128xf32, #tpu.memory_space<vmem>>, vector<256x128xf32>
    %cst_58 = arith.constant dense<0.000000e+00> : vector<8x128xf32>
    %81 = tpu.matmul %79, %80, %cst_58 {dimension_numbers = #tpu.dot_dimension_numbers<[1], [0], [0], [1], [0, 0, 1, 1], [], []>} : vector<8x256xf32>, vector<256x128xf32>, vector<8x128xf32> -> vector<8x128xf32>
    %82 = arith.addf %61, %81 : vector<8x128xf32>
    %c0_59 = arith.constant 0 : index
    %c0_60 = arith.constant 0 : index
    %83 = vector.load %arg6[%c0_59, %c0_60] : memref<8x128xf32, #tpu.memory_space<vmem>>, vector<8x128xf32>
    tpu.vector_store %arg6[%c0_59, %c0_60], %82 {strides = array<i32>} : memref<8x128xf32, #tpu.memory_space<vmem>>, vector<8x128xf32>,
    return
  }
  func.func @transform_0(%arg0: i32) -> (i32, i32) {
    %c0_i32 = arith.constant 0 : i32
    %c0_i32_0 = arith.constant 0 : i32
    return %arg0, %c0_i32 : i32, i32
  }
  func.func @transform_1(%arg0: i32) -> (i32, i32) {
    %c0_i32 = arith.constant 0 : i32
    %c0_i32_0 = arith.constant 0 : i32
    %c0_i32_1 = arith.constant 0 : i32
    return %c0_i32, %c0_i32_0 : i32, i32
  }
  func.func @transform_2(%arg0: i32) -> (i32, i32) {
    %c0_i32 = arith.constant 0 : i32
    %c0_i32_0 = arith.constant 0 : i32
    %c0_i32_1 = arith.constant 0 : i32
    return %c0_i32, %c0_i32_0 : i32, i32
  }
  func.func @transform_3(%arg0: i32) -> (i32, i32) {
    %c0_i32 = arith.constant 0 : i32
    %c0_i32_0 = arith.constant 0 : i32
    %c0_i32_1 = arith.constant 0 : i32
    return %c0_i32, %c0_i32_0 : i32, i32
  }
  func.func @transform_4(%arg0: i32) -> (i32, i32) {
    %c0_i32 = arith.constant 0 : i32
    %c0_i32_0 = arith.constant 0 : i32
    %c0_i32_1 = arith.constant 0 : i32
    return %c0_i32, %c0_i32_0 : i32, i32
  }
  func.func @transform_5(%arg0: i32) -> (i32, i32) {
    %c0_i32 = arith.constant 0 : i32
    %c0_i32_0 = arith.constant 0 : i32
    return %arg0, %c0_i32 : i32, i32
  }
}

</mosaic_0001>

<bundles_post_ra>
// kernel: tpu_custom_call.1
= control target key start
LH: loop header
LB: loop body
LE: loop exit
PB: predicated region body
PF: predicated region fallthrough
CT: control target
= control target key end

     0   :  { %10 = vsyncpa [#allocation3], 0  ;;  %s2303_s0 = inlined_call_operand.vmem [shape: f32[8,1024], index: 0, kind: input, shape index: {}]   ;;  %s2304_s1 = inlined_call_operand.hbm [shape: f32[256,256], index: 1, kind: input, shape index: {}]   ;;  %s2305_s2 = inlined_call_operand.vmem [shape: f32[256,8], index: 2, kind: input, shape index: {}]   ;;  %s2306_s3 = inlined_call_operand.vmem [shape: f32[8,256], index: 3, kind: input, shape index: {}]   ;;  %s2307_s4 = inlined_call_operand.hbm [shape: f32[1024,128], index: 4, kind: input, shape index: {}]   ;;  %s2308_s5 = inlined_call_operand.hbm [shape: f32[8,128], index: 5, kind: output, shape index: {}]  }
   0x1   :  { %11 = vsyncpa [#allocation6], 0 }
   0x2   :  { %12 = vsyncpa [#allocation4], 0  ;;  %s19_s20 = sshll.u32 %s2304_s1, 4  ;;  %s1443_s21 = smov [#allocation2]   ;;  %s20_s20 = int_to_ptr.hbm [resolvable:$true] %s19_s20 }
   0x3   :  { %s21_s22 = sshll.u32 %s1443_s21, 4  ;;  %s36_s25 = sshll.u32 %s2307_s4, 4  ;;  %s22_s22 = int_to_ptr.vmem [resolvable:$true] %s21_s22  ;;  %s37_s25 = int_to_ptr.hbm [resolvable:$true] %s36_s25 }
   0x4   :  { %s1444_s26 = smov 256   ;;  %s1445_s27 = smov 16  }
   0x5   :  { %27 = dma.hbm_to_vmem [thread:$0]  %s20_s20, 8192, %s22_s22, [#allocation3], %s1444_s26, %s1444_s26, %s1445_s27  }
   0x6   :  { %s1446_s28 = smov [#allocation5]   ;;  %s1447_s30 = smov 128  }
   0x7   :  { %s38_s29 = sshll.u32 %s1446_s28, 4  ;;  %s1448_s6 = smov 8   ;;  %s39_s29 = int_to_ptr.vmem [resolvable:$true] %s38_s29 }
   0x8   :  { %44 = dma.hbm_to_vmem [thread:$0]  %s37_s25, 16384, %s39_s29, [#allocation6], %s1447_s30, %s1447_s30, %s1448_s6  }
   0x9   :  { %1437 = dma.done.wait [#allocation3], 8192  }
   0xa   :  { %1438 = vsyncadd [#allocation3], 4294959104 }
   0xb   :  { %1439 = dma.done.wait [#allocation6], 16384  }
   0xc   :  { %1440 = vsyncadd [#allocation6], 4294950912  ;;  %v1486_v0 = vld [vmem:[#allocation2 + $0xf8] sm:$0xff]  ;;  %v1490_v2 = vld [vmem:[#allocation2 + $0xe8] sm:$0xff]  ;;  %vm273_vm0 = vcmask 64512   ;;  %s1222_s24 = sshll.u32 %s2308_s5, 4  ;;  %s1223_s24 = int_to_ptr.hbm [resolvable:$true] %s1222_s24 }
   0xd   :  { %v1488_v1 = vld [vmem:[#allocation2 + $0x1f8] sm:$0xff]  ;;  %159 = vmatpush.msra.mxu2 %v1486_v0  ;;  %v1494_v3 = vld [vmem:[#allocation2 + $0x1e8] sm:$0xff]  ;;  %v1500_v6 = vld [vmem:[#allocation2 + $0xf0] sm:$0xff] }
   0xe   :  { %179 = vmatpush.msra.mxu3 %v1488_v1  ;;  %v1496_v4 = vld [vmem:[#allocation2 + $0xd8] sm:$0xff]  ;;  %v1502_v7 = vld [vmem:[#allocation2 + $0x1f0] sm:$0xff]  ;;  %v1506_v8 = vld [vmem:[#allocation2 + $0xe0] sm:$0xff]  ;;  %119 = vmatpush.msra.mxu0 %v1500_v6 }
   0xf   :  { %v1498_v5 = vld [vmem:[#allocation2 + $0x1d8] sm:$0xff]  ;;  %160 = vmatpush.msra.mxu2 %v1490_v2  ;;  %v1508_v9 = vld [vmem:[#allocation2 + $0x1e0] sm:$0xff]  ;;  %139 = vmatpush.msra.mxu1 %v1502_v7  ;;  %v1512_v10 = vld [vmem:[#allocation2 + $0xc8] sm:$0xff] }
  0x10   :  { %180 = vmatpush.msra.mxu3 %v1494_v3  ;;  %v1514_v11 = vld [vmem:[#allocation2 + $0x1c8] sm:$0xff]  ;;  %v1518_v12 = vld [vmem:[#allocation2 + $0xd0] sm:$0xff]  ;;  %120 = vmatpush.msra.mxu0 %v1506_v8  ;;  %v1524_v14 = vld [vmem:[#allocation2 + $0xb8] sm:$0xff] }
  0x11   :  { %161 = vmatpush.msra.mxu2 %v1496_v4  ;;  %v1520_v13 = vld [vmem:[#allocation2 + $0x1d0] sm:$0xff]  ;;  %140 = vmatpush.msra.mxu1 %v1508_v9  ;;  %v1526_v15 = vld [vmem:[#allocation2 + $0x1b8] sm:$0xff]  ;;  %v1530_v16 = vld [vmem:[#allocation2 + $0xc0] sm:$0xff] }
  0x12   :  { %181 = vmatpush.msra.mxu3 %v1498_v5  ;;  %v1532_v17 = vld [vmem:[#allocation2 + $0x1c0] sm:$0xff]  ;;  %121 = vmatpush.msra.mxu0 %v1518_v12  ;;  %v1536_v18 = vld [vmem:[#allocation2 + $0xa8] sm:$0xff]  ;;  %v1542_v20 = vld [vmem:[#allocation2 + $0xb0] sm:$0xff] }
  0x13   :  { %162 = vmatpush.msra.mxu2 %v1512_v10  ;;  %141 = vmatpush.msra.mxu1 %v1520_v13  ;;  %v1538_v19 = vld [vmem:[#allocation2 + $0x1a8] sm:$0xff]  ;;  %v1544_v21 = vld [vmem:[#allocation2 + $0x1b0] sm:$0xff]  ;;  %v1548_v22 = vld [vmem:[#allocation2 + $0x98] sm:$0xff] }
  0x14   :  { %182 = vmatpush.msra.mxu3 %v1514_v11  ;;  %122 = vmatpush.msra.mxu0 %v1530_v16  ;;  %v1550_v23 = vld [vmem:[#allocation2 + $0x198] sm:$0xff]  ;;  %v1554_v24 = vld [vmem:[#allocation2 + $0xa0] sm:$0xff]  ;;  %v1560_v26 = vld [vmem:[#allocation2 + $0x88] sm:$0xff] }
  0x15   :  { %163 = vmatpush.msra.mxu2 %v1524_v14  ;;  %142 = vmatpush.msra.mxu1 %v1532_v17  ;;  %v1556_v25 = vld [vmem:[#allocation2 + $0x1a0] sm:$0xff]  ;;  %v1562_v27 = vld [vmem:[#allocation2 + $0x188] sm:$0xff]  ;;  %v1566_v28 = vld [vmem:[#allocation2 + $0x90] sm:$0xff] }
  0x16   :  { %183 = vmatpush.msra.mxu3 %v1526_v15  ;;  %123 = vmatpush.msra.mxu0 %v1542_v20  ;;  %v1568_v29 = vld [vmem:[#allocation2 + $0x190] sm:$0xff]  ;;  %v1572_v30 = vld [vmem:[#allocation2 + $0x78] sm:$0xff]  ;;  %v1578_v32 = vld [vmem:[#allocation2 + $0x80] sm:$0xff] }
  0x17   :  { %164 = vmatpush.msra.mxu2 %v1536_v18  ;;  %143 = vmatpush.msra.mxu1 %v1544_v21  ;;  %v1574_v31 = vld [vmem:[#allocation2 + $0x178] sm:$0xff]  ;;  %v1580_v33 = vld [vmem:[#allocation2 + $0x180] sm:$0xff]  ;;  %v1584_v34 = vld [vmem:[#allocation2 + $0x68] sm:$0xff] }
  0x18   :  { %184 = vmatpush.msra.mxu3 %v1538_v19  ;;  %124 = vmatpush.msra.mxu0 %v1554_v24  ;;  %v1586_v35 = vld [vmem:[#allocation2 + $0x168] sm:$0xff]  ;;  %v1590_v36 = vld [vmem:[#allocation2 + $0x70] sm:$0xff]  ;;  %v1596_v38 = vld [vmem:[#allocation2 + $0x58] sm:$0xff] }
  0x19   :  { %165 = vmatpush.msra.mxu2 %v1548_v22  ;;  %144 = vmatpush.msra.mxu1 %v1556_v25  ;;  %v1592_v37 = vld [vmem:[#allocation2 + $0x170] sm:$0xff]  ;;  %v1598_v39 = vld [vmem:[#allocation2 + $0x158] sm:$0xff]  ;;  %v1602_v40 = vld [vmem:[#allocation2 + $0x60] sm:$0xff] }
  0x1a   :  { %185 = vmatpush.msra.mxu3 %v1550_v23  ;;  %125 = vmatpush.msra.mxu0 %v1566_v28  ;;  %v1604_v41 = vld [vmem:[#allocation2 + $0x160] sm:$0xff]  ;;  %v1608_v42 = vld [vmem:[#allocation2 + $0x48] sm:$0xff]  ;;  %v1614_v44 = vld [vmem:[#allocation2 + $0x50] sm:$0xff] }
  0x1b   :  { %166 = vmatpush.msra.mxu2 %v1560_v26  ;;  %145 = vmatpush.msra.mxu1 %v1568_v29  ;;  %v1610_v43 = vld [vmem:[#allocation2 + $0x148] sm:$0xff]  ;;  %v1616_v45 = vld [vmem:[#allocation2 + $0x150] sm:$0xff]  ;;  %v1620_v46 = vld [vmem:[#allocation2 + $0x38] sm:$0xff] }
  0x1c   :  { %186 = vmatpush.msra.mxu3 %v1562_v27  ;;  %126 = vmatpush.msra.mxu0 %v1578_v32  ;;  %v1622_v47 = vld [vmem:[#allocation2 + $0x138] sm:$0xff]  ;;  %v1626_v48 = vld [vmem:[#allocation2 + $0x40] sm:$0xff]  ;;  %v1632_v50 = vld [vmem:[#allocation2 + $0x28] sm:$0xff] }
  0x1d   :  { %167 = vmatpush.msra.mxu2 %v1572_v30  ;;  %146 = vmatpush.msra.mxu1 %v1580_v33  ;;  %v1628_v49 = vld [vmem:[#allocation2 + $0x140] sm:$0xff]  ;;  %2374 = vst [vmem:[#allocation11_spill] sm:$0xff] %v1632_v50  ;;  %v1634_v51 = vld [vmem:[#allocation2 + $0x128] sm:$0xff]  ;;  %v1638_v52 = vld [vmem:[#allocation2 + $0x30] sm:$0xff] }
  0x1e   :  { %187 = vmatpush.msra.mxu3 %v1574_v31  ;;  %127 = vmatpush.msra.mxu0 %v1590_v36  ;;  %2375 = vst [vmem:[#allocation12_spill] sm:$0xff] %v1634_v51  ;;  %v1640_v53 = vld [vmem:[#allocation2 + $0x130] sm:$0xff]  ;;  %v1644_v54 = vld [vmem:[#allocation2 + $0x18] sm:$0xff]  ;;  %v1650_v56 = vld [vmem:[#allocation2 + $0x20] sm:$0xff] }
  0x1f   :  { %168 = vmatpush.msra.mxu2 %v1584_v34  ;;  %147 = vmatpush.msra.mxu1 %v1592_v37  ;;  %2376 = vst [vmem:[#allocation13_spill] sm:$0xff] %v1644_v54  ;;  %v1646_v55 = vld [vmem:[#allocation2 + $0x118] sm:$0xff]  ;;  %v1652_v57 = vld [vmem:[#allocation2 + $0x120] sm:$0xff]  ;;  %v1656_v58 = vld [vmem:[#allocation2 + $0x8] sm:$0xff] }
  0x20   :  { %188 = vmatpush.msra.mxu3 %v1586_v35  ;;  %128 = vmatpush.msra.mxu0 %v1602_v40  ;;  %2377 = vst [vmem:[#allocation14_spill] sm:$0xff] %v1646_v55  ;;  %v1658_v59 = vld [vmem:[#allocation2 + $0x108] sm:$0xff]  ;;  %v1665_v60 = vld [vmem:[%s2303_s0] sm:$0xff]  ;;  %v1674_v62 = vld [vmem:[#allocation2 + $0x10] sm:$0xff] }
  0x21   :  { %169 = vmatpush.msra.mxu2 %v1596_v38  ;;  %148 = vmatpush.msra.mxu1 %v1604_v41  ;;  %2378 = vst [vmem:[#allocation15_spill] sm:$0xff] %v1650_v56  ;;  %v1670_v61 = vld [vmem:[%s2303_s0 + $0x8] sm:$0xff]  ;;  %v1676_v63 = vld [vmem:[#allocation2 + $0x110] sm:$0xff] }
  0x22   :  { %189 = vmatpush.msra.mxu3 %v1598_v39  ;;  %129 = vmatpush.msra.mxu0 %v1614_v44  ;;  %2379 = vst [vmem:[#allocation16_spill] sm:$0xff] %v1652_v57 }
  0x23   :  { %170 = vmatpush.msra.mxu2 %v1608_v42  ;;  %149 = vmatpush.msra.mxu1 %v1616_v45  ;;  %2380 = vst [vmem:[#allocation17_spill] sm:$0xff] %v1656_v58 }
  0x24   :  { %190 = vmatpush.msra.mxu3 %v1610_v43  ;;  %130 = vmatpush.msra.mxu0 %v1626_v48  ;;  %2381 = vst [vmem:[#allocation18_spill] sm:$0xff] %v1658_v59 }
  0x25   :  { %171 = vmatpush.msra.mxu2 %v1620_v46  ;;  %150 = vmatpush.msra.mxu1 %v1628_v49  ;;  %2382 = vst [vmem:[#allocation19_spill] sm:$0xff] %v1665_v60 }
  0x26   :  { %191 = vmatpush.msra.mxu3 %v1622_v47  ;;  %131 = vmatpush.msra.mxu0 %v1638_v52  ;;  %2383 = vst [vmem:[#allocation20_spill] sm:$0xff] %v1670_v61 }
  0x27   :  { %172 = vmatpush.msra.mxu2 %v1632_v50  ;;  %151 = vmatpush.msra.mxu1 %v1640_v53  ;;  %2384 = vst [vmem:[#allocation21_spill] sm:$0xff] %v1674_v62  ;;  %v1712_v50 = vld [vmem:[%s2305_s2 + $0xf0] sm:$0xff] }
  0x28   :  { %192 = vmatpush.msra.mxu3 %v1634_v51  ;;  %132 = vmatpush.msra.mxu0 %v1650_v56  ;;  %2385 = vst [vmem:[#allocation22_spill] sm:$0xff] %v1676_v63  ;;  %v1691_v51 = vld [vmem:[%s2305_s2 + $0x78] sm:$0xff] }
  0x29   :  { %173 = vmatpush.msra.mxu2 %v1644_v54  ;;  %152 = vmatpush.msra.mxu1 %v1652_v57  ;;  %v1684_v54 = vld [vmem:[#allocation2 + $0x100] sm:$0xff]  ;;  %2388 = vst [vmem:[#allocation25_spill] sm:$0xff] %v1691_v51 }
  0x2a   :  { %193 = vmatpush.msra.mxu3 %v1646_v55  ;;  %v1682_v55 = vld [vmem:[#allocation2] sm:$0xff]  ;;  %2387 = vst [vmem:[#allocation24_spill] sm:$0xff] %v1684_v54  ;;  %133 = vmatpush.msra.mxu0 %v1674_v62 }
  0x2b   :  { %174 = vmatpush.msra.mxu2 %v1656_v58  ;;  %2386 = vst [vmem:[#allocation23_spill] sm:$0xff] %v1682_v55  ;;  %153 = vmatpush.msra.mxu1 %v1676_v63  ;;  %v1707_v58 = vld [vmem:[%s2305_s2 + $0x70] sm:$0xff] }
  0x2c   :  { %194 = vmatpush.msra.mxu3 %v1658_v59  ;;  %175 = vmatmul.f32.vlgmr.msra.gmra.mxu2 %v1665_v60  ;;  %v1696_v59 = vld [vmem:[%s2305_s2 + $0xf8] sm:$0xff]  ;;  %2390 = vst [vmem:[#allocation27_spill] sm:$0xff] %v1707_v58 }
  0x2d   :  { %195 = vmatmul.f32.vlgmr.msra.gmra.mxu3 %v1670_v61  ;;  %2389 = vst [vmem:[#allocation26_spill] sm:$0xff] %v1696_v59  ;;  %379 = vmatpush.msrb.mxu2 %v1500_v6  ;;  %v1719_v6 = vld [vmem:[%s2305_s2 + $0x68] sm:$0xff] }
  0x2e   :  { %399 = vmatpush.msrb.mxu3 %v1502_v7  ;;  %134 = vmatpush.msra.mxu0 %v1682_v55  ;;  %2391 = vst [vmem:[#allocation28_spill] sm:$0xff] %v1712_v50  ;;  %v1724_v7 = vld [vmem:[%s2305_s2 + $0xe8] sm:$0xff] }
  0x2f   :  { %154 = vmatpush.msra.mxu1 %v1684_v54  ;;  %135 = vmatmul.f32.vlgmr.msra.gmra.mxu0 %v1665_v60  ;;  %2392 = vst [vmem:[#allocation29_spill] sm:$0xff] %v1719_v6  ;;  %v1738_v60 = vld [vmem:[%s2305_s2 + $0xe0] sm:$0xff] }
  0x30   :  { %155 = vmatmul.f32.vlgmr.msra.gmra.mxu1 %v1670_v61  ;;  %233 = vmatpush.msrb.mxu0 %v1691_v51  ;;  %2393 = vst [vmem:[#allocation30_spill] sm:$0xff] %v1724_v7  ;;  %v1733_v61 = vld [vmem:[%s2305_s2 + $0x60] sm:$0xff] }
  0x31   :  { %253 = vmatpush.msrb.mxu1 %v1696_v59  ;;  %380 = vmatpush.msrb.mxu2 %v1506_v8  ;;  %2394 = vst [vmem:[#allocation31_spill] sm:$0xff] %v1733_v61  ;;  %v1747_v8 = vld [vmem:[%s2305_s2 + $0x58] sm:$0xff] }
  0x32   :  { %400 = vmatpush.msrb.mxu3 %v1508_v9  ;;  %234 = vmatpush.msrb.mxu0 %v1707_v58  ;;  %2395 = vst [vmem:[#allocation32_spill] sm:$0xff] %v1738_v60  ;;  %v1752_v9 = vld [vmem:[%s2305_s2 + $0xd8] sm:$0xff] }
  0x33   :  { %254 = vmatpush.msrb.mxu1 %v1712_v50  ;;  %381 = vmatpush.msrb.mxu2 %v1518_v12  ;;  %2396 = vst [vmem:[#allocation33_spill] sm:$0xff] %v1747_v8  ;;  %v1761_v12 = vld [vmem:[%s2305_s2 + $0x50] sm:$0xff] }
  0x34   :  { %401 = vmatpush.msrb.mxu3 %v1520_v13  ;;  %235 = vmatpush.msrb.mxu0 %v1719_v6  ;;  %2397 = vst [vmem:[#allocation34_spill] sm:$0xff] %v1752_v9  ;;  %v1766_v13 = vld [vmem:[%s2305_s2 + $0xd0] sm:$0xff] }
  0x35   :  { %255 = vmatpush.msrb.mxu1 %v1724_v7  ;;  %382 = vmatpush.msrb.mxu2 %v1530_v16  ;;  %2398 = vst [vmem:[#allocation35_spill] sm:$0xff] %v1761_v12  ;;  %v1775_v16 = vld [vmem:[%s2305_s2 + $0x48] sm:$0xff] }
  0x36   :  { %402 = vmatpush.msrb.mxu3 %v1532_v17  ;;  %236 = vmatpush.msrb.mxu0 %v1733_v61  ;;  %2399 = vst [vmem:[#allocation36_spill] sm:$0xff] %v1766_v13  ;;  %v1780_v17 = vld [vmem:[%s2305_s2 + $0xc8] sm:$0xff] }
  0x37   :  { %256 = vmatpush.msrb.mxu1 %v1738_v60  ;;  %383 = vmatpush.msrb.mxu2 %v1542_v20  ;;  %2400 = vst [vmem:[#allocation37_spill] sm:$0xff] %v1775_v16  ;;  %v1789_v20 = vld [vmem:[%s2305_s2 + $0x40] sm:$0xff] }
  0x38   :  { %403 = vmatpush.msrb.mxu3 %v1544_v21  ;;  %237 = vmatpush.msrb.mxu0 %v1747_v8  ;;  %2401 = vst [vmem:[#allocation38_spill] sm:$0xff] %v1780_v17  ;;  %v1794_v21 = vld [vmem:[%s2305_s2 + $0xc0] sm:$0xff] }
  0x39   :  { %257 = vmatpush.msrb.mxu1 %v1752_v9  ;;  %384 = vmatpush.msrb.mxu2 %v1554_v24  ;;  %2402 = vst [vmem:[#allocation39_spill] sm:$0xff] %v1789_v20  ;;  %v1803_v24 = vld [vmem:[%s2305_s2 + $0x38] sm:$0xff] }
  0x3a   :  { %404 = vmatpush.msrb.mxu3 %v1556_v25  ;;  %238 = vmatpush.msrb.mxu0 %v1761_v12  ;;  %2403 = vst [vmem:[#allocation40_spill] sm:$0xff] %v1794_v21  ;;  %v1808_v25 = vld [vmem:[%s2305_s2 + $0xb8] sm:$0xff] }
  0x3b   :  { %258 = vmatpush.msrb.mxu1 %v1766_v13  ;;  %385 = vmatpush.msrb.mxu2 %v1566_v28  ;;  %2404 = vst [vmem:[#allocation41_spill] sm:$0xff] %v1803_v24  ;;  %v1817_v28 = vld [vmem:[%s2305_s2 + $0x30] sm:$0xff] }
  0x3c   :  { %405 = vmatpush.msrb.mxu3 %v1568_v29  ;;  %239 = vmatpush.msrb.mxu0 %v1775_v16  ;;  %2405 = vst [vmem:[#allocation42_spill] sm:$0xff] %v1808_v25  ;;  %v1822_v29 = vld [vmem:[%s2305_s2 + $0xb0] sm:$0xff] }
  0x3d   :  { %259 = vmatpush.msrb.mxu1 %v1780_v17  ;;  %386 = vmatpush.msrb.mxu2 %v1578_v32  ;;  %2406 = vst [vmem:[#allocation43_spill] sm:$0xff] %v1817_v28  ;;  %v1831_v32 = vld [vmem:[%s2305_s2 + $0x28] sm:$0xff] }
  0x3e   :  { %406 = vmatpush.msrb.mxu3 %v1580_v33  ;;  %240 = vmatpush.msrb.mxu0 %v1789_v20  ;;  %2407 = vst [vmem:[#allocation44_spill] sm:$0xff] %v1822_v29  ;;  %v1836_v33 = vld [vmem:[%s2305_s2 + $0xa8] sm:$0xff] }
  0x3f   :  { %260 = vmatpush.msrb.mxu1 %v1794_v21  ;;  %387 = vmatpush.msrb.mxu2 %v1590_v36  ;;  %2408 = vst [vmem:[#allocation45_spill] sm:$0xff] %v1831_v32 }
  0x40   :  { %407 = vmatpush.msrb.mxu3 %v1592_v37  ;;  %241 = vmatpush.msrb.mxu0 %v1803_v24  ;;  %2409 = vst [vmem:[#allocation46_spill] sm:$0xff] %v1836_v33 }
  0x41   :  { %261 = vmatpush.msrb.mxu1 %v1808_v25  ;;  %388 = vmatpush.msrb.mxu2 %v1602_v40 }
  0x42   :  { %408 = vmatpush.msrb.mxu3 %v1604_v41  ;;  %242 = vmatpush.msrb.mxu0 %v1817_v28 }
  0x43   :  { %262 = vmatpush.msrb.mxu1 %v1822_v29  ;;  %389 = vmatpush.msrb.mxu2 %v1614_v44 }
  0x44   :  { %409 = vmatpush.msrb.mxu3 %v1616_v45  ;;  %243 = vmatpush.msrb.mxu0 %v1831_v32 }
  0x45   :  { %263 = vmatpush.msrb.mxu1 %v1836_v33  ;;  %390 = vmatpush.msrb.mxu2 %v1626_v48 }
  0x46   :  { %410 = vmatpush.msrb.mxu3 %v1628_v49 }
  0x47   :  { %391 = vmatpush.msrb.mxu2 %v1638_v52 }
  0x48   :  { %411 = vmatpush.msrb.mxu3 %v1640_v53 }
  0x49   :  { %392 = vmatpush.msrb.mxu2 %v1650_v56 }
  0x4a   :  { %412 = vmatpush.msrb.mxu3 %v1652_v57 }
  0x4b   :  { %393 = vmatpush.msrb.mxu2 %v1674_v62  ;;  %v352_v62 = vld [vmem:[#allocation5 + $0x38] sm:$0xff] }
  0x4c   :  { %413 = vmatpush.msrb.mxu3 %v1676_v63 }
  0x4d   :  { %394 = vmatpush.msrb.mxu2 %v1682_v55  ;;  %v355_v55 = vld [vmem:[#allocation5 + $0x50] sm:$0xff] }
  0x4e   :  { %414 = vmatpush.msrb.mxu3 %v1684_v54  ;;  %v374_v54 = vld [vmem:[#allocation5 + $0xe8] sm:$0xff] }
  0x4f   :  { %461 = vmatpush.msra.mxu2 %v1691_v51  ;;  %v375_v51 = vld [vmem:[#allocation5 + $0xf0] sm:$0xff] }
  0x50   :  { %481 = vmatpush.msra.mxu3 %v1696_v59  ;;  %v376_v59 = vld [vmem:[#allocation5 + $0xf8] sm:$0xff] }
  0x51   :  { %462 = vmatpush.msra.mxu2 %v1707_v58  ;;  %v357_v58 = vld [vmem:[#allocation5 + $0x60] sm:$0xff] }
  0x52   :  { %482 = vmatpush.msra.mxu3 %v1712_v50 }
  0x53   :  { %463 = vmatpush.msra.mxu2 %v1719_v6  ;;  %v358_v6 = vld [vmem:[#allocation5 + $0x68] sm:$0xff] }
  0x54   :  { %483 = vmatpush.msra.mxu3 %v1724_v7 }
  0x55   :  { %464 = vmatpush.msra.mxu2 %v1733_v61 }
  0x56   :  { %484 = vmatpush.msra.mxu3 %v1738_v60 }
  0x57   :  { %465 = vmatpush.msra.mxu2 %v1747_v8  ;;  %v359_v8 = vld [vmem:[#allocation5 + $0x70] sm:$0xff] }
  0x58   :  { %485 = vmatpush.msra.mxu3 %v1752_v9 }
  0x59   :  { %466 = vmatpush.msra.mxu2 %v1761_v12 }
  0x5a   :  { %486 = vmatpush.msra.mxu3 %v1766_v13 }
  0x5b   :  { %467 = vmatpush.msra.mxu2 %v1775_v16 }
  0x5c   :  { %487 = vmatpush.msra.mxu3 %v1780_v17  ;;  %v1881_v17 = vld [vmem:[%s2305_s2 + $0x20] sm:$0xff] }
  0x5d   :  { %468 = vmatpush.msra.mxu2 %v1789_v20  ;;  %2410 = vst [vmem:[#allocation47_spill] sm:$0xff] %v1881_v17  ;;  %244 = vmatpush.msrb.mxu0 %v1881_v17 }
  0x5e   :  { %488 = vmatpush.msra.mxu3 %v1794_v21  ;;  %v1886_v21 = vld [vmem:[%s2305_s2 + $0xa0] sm:$0xff] }
  0x5f   :  { %469 = vmatpush.msra.mxu2 %v1803_v24  ;;  %2411 = vst [vmem:[#allocation48_spill] sm:$0xff] %v1886_v21  ;;  %264 = vmatpush.msrb.mxu1 %v1886_v21  ;;  %v1936_v24 = vld [vmem:[%s2305_s2 + $0x80] sm:$0xff] }
  0x60   :  { %489 = vmatpush.msra.mxu3 %v1808_v25  ;;  %v1931_v25 = vld [vmem:[%s2305_s2] sm:$0xff]  ;;  %2419 = vst [vmem:[#allocation56_spill] sm:$0xff] %v1936_v24 }
  0x61   :  { %470 = vmatpush.msra.mxu2 %v1817_v28  ;;  %v1912_v28 = vld [vmem:[%s2305_s2 + $0x90] sm:$0xff]  ;;  %2418 = vst [vmem:[#allocation55_spill] sm:$0xff] %v1931_v25 }
  0x62   :  { %490 = vmatpush.msra.mxu3 %v1822_v29  ;;  %v1907_v29 = vld [vmem:[%s2305_s2 + $0x10] sm:$0xff]  ;;  %2415 = vst [vmem:[#allocation52_spill] sm:$0xff] %v1912_v28 }
  0x63   :  { %471 = vmatpush.msra.mxu2 %v1831_v32  ;;  %v1893_v32 = vld [vmem:[%s2305_s2 + $0x18] sm:$0xff]  ;;  %2414 = vst [vmem:[#allocation51_spill] sm:$0xff] %v1907_v29 }
  0x64   :  { %491 = vmatpush.msra.mxu3 %v1836_v33  ;;  %2412 = vst [vmem:[#allocation49_spill] sm:$0xff] %v1893_v32  ;;  %v1898_v33 = vld [vmem:[%s2305_s2 + $0x98] sm:$0xff]  ;;  %245 = vmatpush.msrb.mxu0 %v1893_v32 }
  0x65   :  { %2413 = vst [vmem:[#allocation50_spill] sm:$0xff] %v1898_v33  ;;  %472 = vmatpush.msra.mxu2 %v1881_v17  ;;  %265 = vmatpush.msrb.mxu1 %v1898_v33  ;;  %v1917_v17 = vld [vmem:[%s2305_s2 + $0x8] sm:$0xff] }
  0x66   :  { %492 = vmatpush.msra.mxu3 %v1886_v21  ;;  %2416 = vst [vmem:[#allocation53_spill] sm:$0xff] %v1917_v17  ;;  %v1922_v21 = vld [vmem:[%s2305_s2 + $0x88] sm:$0xff]  ;;  %246 = vmatpush.msrb.mxu0 %v1907_v29 }
  0x67   :  { %2417 = vst [vmem:[#allocation54_spill] sm:$0xff] %v1922_v21  ;;  %473 = vmatpush.msra.mxu2 %v1893_v32  ;;  %266 = vmatpush.msrb.mxu1 %v1912_v28 }
  0x68   :  { %493 = vmatpush.msra.mxu3 %v1898_v33  ;;  %247 = vmatpush.msrb.mxu0 %v1917_v17 }
  0x69   :  { %474 = vmatpush.msra.mxu2 %v1907_v29  ;;  %267 = vmatpush.msrb.mxu1 %v1922_v21 }
  0x6a   :  { %494 = vmatpush.msra.mxu3 %v1912_v28  ;;  %248 = vmatpush.msrb.mxu0 %v1931_v25 }
  0x6b   :  { %475 = vmatpush.msra.mxu2 %v1917_v17  ;;  %268 = vmatpush.msrb.mxu1 %v1936_v24 }
  0x6c   :  { %495 = vmatpush.msra.mxu3 %v1922_v21 }
  0x6d   :  { %476 = vmatpush.msra.mxu2 %v1931_v25 }
  0x6e   :  { %496 = vmatpush.msra.mxu3 %v1936_v24  ;;  %v360_v24 = vld [vmem:[#allocation5 + $0x78] sm:$0xff] }
  0xac   :  { %v136_v33 = vpop.f32.mrf.mxu0 }
  0xad   :  { %v156_v29 = vpop.f32.mrf.mxu1 }
  0xae   :  { %v157_v32 = vadd.f32 %v156_v29, %v136_v33  ;;  %v1952_v29 = vld [vmem:[%s2306_s3] sm:$0xff] }
  0xaf   :  { %v176_v28 = vpop.f32.mrf.mxu2  ;;  %318 = vmatpush.msra.mxu0 %v1952_v29  ;;  %v2423_v33 = vld [vmem:[#allocation14_spill] sm:$0xff] }
  0xb0   :  { %v196_v20 = vpop.f32.mrf.mxu3  ;;  %1248 = vtanh.f32 %v157_v32  ;;  %v2422_v32 = vld [vmem:[#allocation13_spill] sm:$0xff] }
  0xb1   :  { %v197_v16 = vadd.f32 %v196_v20, %v176_v28 }
  0xb3   :  { %1250 = vtanh.f32 %v197_v16  ;;  %v1957_v16 = vld [vmem:[%s2306_s3 + $0x8] sm:$0xff] }
  0xb4   :  { %338 = vmatpush.msra.mxu1 %v1957_v16 }
  0xb6   :  { %v1249_v13 = vpop.eup %1248 }
  0xb7   :  { %249 = vmatmul.f32.vlgmr.msrb.gmra.mxu0 %v1249_v13  ;;  %v1962_v13 = vld [vmem:[%s2303_s0 + $0x10] sm:$0xff] }
  0xb8   :  { %419 = vmatpush.msrb.mxu0 %v1486_v0  ;;  %395 = vmatmul.f32.vlgmr.msrb.gmra.mxu2 %v1962_v13 }
  0xb9   :  { %v1251_v17 = vpop.eup %1250  ;;  %642 = vmatpush.msrb.mxu2 %v360_v24  ;;  %v354_v24 = vld [vmem:[#allocation5 + $0x48] sm:$0xff] }
  0xba   :  { %269 = vmatmul.f32.vlgmr.msrb.gmra.mxu1 %v1251_v17  ;;  %420 = vmatpush.msrb.mxu0 %v1490_v2 }
  0xbb   :  { %439 = vmatpush.msrb.mxu1 %v1488_v1  ;;  %643 = vmatpush.msrb.mxu2 %v359_v8 }
  0xbc   :  { %421 = vmatpush.msrb.mxu0 %v1496_v4 }
  0xbd   :  { %440 = vmatpush.msrb.mxu1 %v1494_v3  ;;  %644 = vmatpush.msrb.mxu2 %v358_v6 }
  0xbe   :  { %422 = vmatpush.msrb.mxu0 %v1512_v10 }
  0xbf   :  { %441 = vmatpush.msrb.mxu1 %v1498_v5  ;;  %645 = vmatpush.msrb.mxu2 %v357_v58  ;;  %v351_v58 = vld [vmem:[#allocation5 + $0x30] sm:$0xff] }
  0xc0   :  { %423 = vmatpush.msrb.mxu0 %v1524_v14 }
  0xc1   :  { %442 = vmatpush.msrb.mxu1 %v1514_v11 }
  0xc2   :  { %424 = vmatpush.msrb.mxu0 %v1536_v18 }
  0xc3   :  { %443 = vmatpush.msrb.mxu1 %v1526_v15 }
  0xc4   :  { %425 = vmatpush.msrb.mxu0 %v1548_v22 }
  0xc5   :  { %444 = vmatpush.msrb.mxu1 %v1538_v19 }
  0xc6   :  { %426 = vmatpush.msrb.mxu0 %v1560_v26 }
  0xc7   :  { %445 = vmatpush.msrb.mxu1 %v1550_v23 }
  0xc8   :  { %427 = vmatpush.msrb.mxu0 %v1572_v30 }
  0xc9   :  { %446 = vmatpush.msrb.mxu1 %v1562_v27 }
  0xca   :  { %428 = vmatpush.msrb.mxu0 %v1584_v34 }
  0xcb   :  { %447 = vmatpush.msrb.mxu1 %v1574_v31 }
  0xcc   :  { %429 = vmatpush.msrb.mxu0 %v1596_v38 }
  0xcd   :  { %448 = vmatpush.msrb.mxu1 %v1586_v35 }
  0xce   :  { %430 = vmatpush.msrb.mxu0 %v1608_v42 }
  0xcf   :  { %449 = vmatpush.msrb.mxu1 %v1598_v39 }
  0xd0   :  { %431 = vmatpush.msrb.mxu0 %v1620_v46 }
  0xd1   :  { %450 = vmatpush.msrb.mxu1 %v1610_v43 }
  0xd3   :  { %451 = vmatpush.msrb.mxu1 %v1622_v47 }
 0x134   :  { %v250_v21 = vpop.f32.mrf.mxu0 }
 0x137   :  { %v270_v12 = vpop.f32.mrf.mxu1 }
 0x138   :  { %v271_v9 = vadd.f32 %v270_v12, %v250_v21  ;;  %v1969_v12 = vld [vmem:[%s2303_s0 + $0x18] sm:$0xff] }
 0x139   :  { %415 = vmatmul.f32.vlgmr.msrb.gmra.mxu3 %v1969_v12 }
 0x13a   :  { %v274_v25 = vsel %vm273_vm0, %v271_v9, -inf  ;;  %662 = vmatpush.msrb.mxu3 %v376_v59 }
 0x13b   :  { %275 = vmax.xlane.f32.xlu0 %v274_v25  ;;  %v2420_v25 = vld [vmem:[#allocation11_spill] sm:$0xff]  ;;  %v396_v60 = vpop.f32.mrf.mxu2 }
 0x13c   :  { %432 = vmatpush.msrb.mxu0 %v2420_v25  ;;  %663 = vmatpush.msrb.mxu3 %v375_v51 }
 0x13e   :  { %433 = vmatpush.msrb.mxu0 %v2422_v32  ;;  %664 = vmatpush.msrb.mxu3 %v374_v54 }
 0x1ae   :  { %v276_v17 = vpop.xlane.xlu0 %275 }
 0x1af   :  { %v277_v20 = vsub.f32 %v271_v9, %v276_v17  ;;  %v2421_v9 = vld [vmem:[#allocation12_spill] sm:$0xff] }
 0x1b0   :  { %452 = vmatpush.msrb.mxu1 %v2421_v9 }
 0x1b1   :  { %v278_v21 = vmul.f32 1.442695, %v277_v20  ;;  %v2424_v20 = vld [vmem:[#allocation17_spill] sm:$0xff] }
 0x1b2   :  { %453 = vmatpush.msrb.mxu1 %v2423_v33  ;;  %434 = vmatpush.msrb.mxu0 %v2424_v20 }
 0x1b3   :  { %1252 = vpow2.f32 %v278_v21  ;;  %v2425_v21 = vld [vmem:[#allocation18_spill] sm:$0xff] }
 0x1b4   :  { %454 = vmatpush.msrb.mxu1 %v2425_v21 }
 0x1b9   :  { %v1253_v28 = vpop.eup %1252 }
 0x1ba   :  { %v280_v17 = vsel %vm273_vm0, %v1253_v28, 0.0 }
 0x1bb   :  { %281 = vadd.xlane.f32.xlu0 %v280_v17  ;;  %v356_v17 = vld [vmem:[#allocation5 + $0x58] sm:$0xff] }
 0x1bc   :  { %v416_v61 = vpop.f32.mrf.mxu3  ;;  %646 = vmatpush.msrb.mxu2 %v356_v17  ;;  %v350_v17 = vld [vmem:[#allocation5 + $0x28] sm:$0xff] }
 0x1bd   :  { %v417_v7 = vadd.f32 %v416_v61, %v396_v60 }
 0x1be   :  { %647 = vmatpush.msrb.mxu2 %v355_v55  ;;  %v349_v55 = vld [vmem:[#allocation5 + $0x20] sm:$0xff] }
 0x1bf   :  { %1254 = vtanh.f32 %v417_v7  ;;  %v353_v7 = vld [vmem:[#allocation5 + $0x40] sm:$0xff] }
 0x1c0   :  { %648 = vmatpush.msrb.mxu2 %v354_v24 }
 0x1c2   :  { %649 = vmatpush.msrb.mxu2 %v353_v7  ;;  %v347_v7 = vld [vmem:[#allocation5 + $0x10] sm:$0xff] }
 0x1c4   :  { %650 = vmatpush.msrb.mxu2 %v352_v62  ;;  %v372_v62 = vld [vmem:[#allocation5 + $0xd8] sm:$0xff] }
 0x1c5   :  { %v1255_v63 = vpop.eup %1254 }
 0x1c6   :  { %477 = vmatmul.f32.vlgmr.msra.gmra.mxu2 %v1255_v63 }
 0x1c7   :  { %651 = vmatpush.msrb.mxu2 %v351_v58  ;;  %v366_v58 = vld [vmem:[#allocation5 + $0xa8] sm:$0xff] }
 0x1c9   :  { %652 = vmatpush.msrb.mxu2 %v350_v17  ;;  %v596_v17 = vld [vmem:[#allocation5 + $0x1d0] sm:$0xff] }
 0x1cb   :  { %653 = vmatpush.msrb.mxu2 %v349_v55 }
 0x22e   :  { %v282_v50 = vpop.xlane.xlu0 %281 }
 0x22f   :  { %1256 = vrcp.f32 %v282_v50  ;;  %v294_v57 = vand.u32 2147483648, %v282_v50  ;;  %v292_v6 = vand.u32 2147483647, %v282_v50  ;;  %vm288_vm2 = vweird.f32 %v282_v50 }
 0x231   :  { %v295_v54 = vor.u32 1.1754944e-38, %v294_v57  ;;  %vm293_vm4 = vcmp.eq.f32.partialorder %v292_v6, 8.507059e+37  ;;  %v345_v57 = vld [vmem:[#allocation5] sm:$0xff]  ;;  %v367_v6 = vld [vmem:[#allocation5 + $0xb0] sm:$0xff] }
 0x235   :  { %v1257_v60 = vpop.eup %1256 }
 0x236   :  { %v284_v61 = vmul.f32 %v1257_v60, %v282_v50  ;;  %vm289_vm1 = vweird.f32 %v1257_v60  ;;  %v346_v50 = vld [vmem:[#allocation5 + $0x8] sm:$0xff] }
 0x237   :  { %vm290_vm3 = vmor %vm288_vm2, %vm289_vm1 }
 0x238   :  { %v285_v8 = vsub.f32 1.0, %v284_v61  ;;  %v348_v61 = vld [vmem:[#allocation5 + $0x18] sm:$0xff] }
 0x239   :  { %654 = vmatpush.msrb.mxu2 %v348_v61  ;;  %v594_v61 = vld [vmem:[#allocation5 + $0x1c0] sm:$0xff] }
 0x23a   :  { %v286_v59 = vmul.f32 %v1257_v60, %v285_v8  ;;  %v369_v8 = vld [vmem:[#allocation5 + $0xc0] sm:$0xff] }
 0x23b   :  { %655 = vmatpush.msrb.mxu2 %v347_v7  ;;  %v577_v7 = vld [vmem:[#allocation5 + $0x138] sm:$0xff] }
 0x23c   :  { %v287_v51 = vadd.f32 %v1257_v60, %v286_v59  ;;  %v368_v59 = vld [vmem:[#allocation5 + $0xb8] sm:$0xff] }
 0x23d   :  { %656 = vmatpush.msrb.mxu2 %v346_v50  ;;  %v593_v50 = vld [vmem:[#allocation5 + $0x1b8] sm:$0xff] }
 0x23e   :  { %v291_v63 = vsel %vm290_vm3, %v1257_v60, %v287_v51  ;;  %v370_v60 = vld [vmem:[#allocation5 + $0xc8] sm:$0xff] }
 0x23f   :  { %v296_v56 = vsel %vm293_vm4, %v295_v54, %v291_v63  ;;  %657 = vmatpush.msrb.mxu2 %v345_v57  ;;  %v579_v54 = vld [vmem:[#allocation5 + $0x148] sm:$0xff]  ;;  %v592_v57 = vld [vmem:[#allocation5 + $0x1b0] sm:$0xff] }
 0x240   :  { %v297_v24 = vmul.f32 %v1253_v28, %v296_v56  ;;  %v373_v56 = vld [vmem:[#allocation5 + $0xe0] sm:$0xff]  ;;  %v371_v28 = vld [vmem:[#allocation5 + $0xd0] sm:$0xff]  ;;  %v595_v63 = vld [vmem:[#allocation5 + $0x1c8] sm:$0xff] }
 0x241   :  { %665 = vmatpush.msrb.mxu3 %v373_v56  ;;  %724 = vmatpush.msra.mxu2 %v1486_v0  ;;  %v365_v0 = vld [vmem:[#allocation5 + $0xa0] sm:$0xff]  ;;  %v576_v56 = vld [vmem:[#allocation5 + $0x130] sm:$0xff] }
 0x242   :  { %1233 = vmatmul.msk.f32.vlgmr.msra.gmra.mxu0 %vm273_vm0, %v297_v24  ;;  %1234 = vmatmul.msk.f32.vlgmr.msra.gmra.mxu1 %vm273_vm0, %v297_v24  ;;  %v578_v24 = vld [vmem:[#allocation5 + $0x140] sm:$0xff] }
 0x243   :  { %543 = vmatpush.msra.mxu0 %v1952_v29  ;;  %563 = vmatpush.msra.mxu1 %v1957_v16 }
 0x244   :  { %666 = vmatpush.msrb.mxu3 %v372_v62  ;;  %725 = vmatpush.msra.mxu2 %v1490_v2  ;;  %v364_v2 = vld [vmem:[#allocation5 + $0x98] sm:$0xff]  ;;  %v575_v62 = vld [vmem:[#allocation5 + $0x128] sm:$0xff] }
 0x246   :  { %667 = vmatpush.msrb.mxu3 %v371_v28  ;;  %726 = vmatpush.msra.mxu2 %v1496_v4  ;;  %v363_v4 = vld [vmem:[#allocation5 + $0x90] sm:$0xff]  ;;  %v591_v28 = vld [vmem:[#allocation5 + $0x1a8] sm:$0xff] }
 0x248   :  { %668 = vmatpush.msrb.mxu3 %v370_v60  ;;  %727 = vmatpush.msra.mxu2 %v1512_v10  ;;  %v362_v10 = vld [vmem:[#allocation5 + $0x88] sm:$0xff] }
 0x24a   :  { %435 = vmatmul.f32.vlgmr.msrb.gmra.mxu0 %v1962_v13  ;;  %455 = vmatmul.f32.vlgmr.msrb.gmra.mxu1 %v1969_v12 }
 0x24b   :  { %669 = vmatpush.msrb.mxu3 %v369_v8  ;;  %728 = vmatpush.msra.mxu2 %v1524_v14  ;;  %v361_v14 = vld [vmem:[#allocation5 + $0x80] sm:$0xff] }
 0x24d   :  { %670 = vmatpush.msrb.mxu3 %v368_v59  ;;  %729 = vmatpush.msra.mxu2 %v1536_v18  ;;  %v574_v59 = vld [vmem:[#allocation5 + $0x120] sm:$0xff] }
 0x24f   :  { %671 = vmatpush.msrb.mxu3 %v367_v6  ;;  %730 = vmatpush.msra.mxu2 %v1548_v22  ;;  %v590_v6 = vld [vmem:[#allocation5 + $0x1a0] sm:$0xff] }
 0x251   :  { %672 = vmatpush.msrb.mxu3 %v366_v58  ;;  %731 = vmatpush.msra.mxu2 %v1560_v26  ;;  %v2426_v26 = vld [vmem:[#allocation19_spill] sm:$0xff] }
 0x253   :  { %673 = vmatpush.msrb.mxu3 %v365_v0  ;;  %732 = vmatpush.msra.mxu2 %v1572_v30  ;;  %v573_v0 = vld [vmem:[#allocation5 + $0x118] sm:$0xff] }
 0x255   :  { %674 = vmatpush.msrb.mxu3 %v364_v2  ;;  %733 = vmatpush.msra.mxu2 %v1584_v34  ;;  %v589_v2 = vld [vmem:[#allocation5 + $0x198] sm:$0xff] }
 0x257   :  { %675 = vmatpush.msrb.mxu3 %v363_v4  ;;  %734 = vmatpush.msra.mxu2 %v1596_v38 }
 0x259   :  { %676 = vmatpush.msrb.mxu3 %v362_v10  ;;  %735 = vmatpush.msra.mxu2 %v1608_v42 }
 0x25b   :  { %677 = vmatpush.msrb.mxu3 %v361_v14  ;;  %736 = vmatpush.msra.mxu2 %v1620_v46  ;;  %v2427_v46 = vld [vmem:[#allocation20_spill] sm:$0xff] }
 0x25d   :  { %737 = vmatpush.msra.mxu2 %v2420_v25 }
 0x25f   :  { %738 = vmatpush.msra.mxu2 %v2422_v32  ;;  %v598_v32 = vld [vmem:[#allocation5 + $0x1e0] sm:$0xff] }
 0x261   :  { %739 = vmatpush.msra.mxu2 %v2424_v20  ;;  %v597_v20 = vld [vmem:[#allocation5 + $0x1d8] sm:$0xff] }
 0x2bf   :  { %v320_v18 = vpop.f32.mrf.mxu0  ;;  %v340_v22 = vpop.f32.mrf.mxu1 }
 0x2c0   :  { %v343_v30 = vmul.f32 %v320_v18, %v2426_v26  ;;  %v344_v25 = vmul.f32 %v340_v22, %v2427_v46  ;;  %v572_v18 = vld [vmem:[#allocation5 + $0x110] sm:$0xff]  ;;  %v586_v46 = vld [vmem:[#allocation5 + $0x180] sm:$0xff] }
 0x2c1   :  { %v588_v22 = vld [vmem:[#allocation5 + $0x190] sm:$0xff] }
 0x2c2   :  { %658 = vmatmul.f32.vlgmr.msrb.gmra.mxu2 %v343_v30  ;;  %v571_v30 = vld [vmem:[#allocation5 + $0x108] sm:$0xff] }
 0x2c3   :  { %848 = vmatpush.msrb.mxu2 %v1952_v29  ;;  %v583_v29 = vld [vmem:[#allocation5 + $0x168] sm:$0xff] }
 0x2c7   :  { %v436_v34 = vpop.f32.mrf.mxu0  ;;  %v456_v38 = vpop.f32.mrf.mxu1 }
 0x2c8   :  { %v457_v51 = vadd.f32 %v456_v38, %v436_v34  ;;  %v587_v34 = vld [vmem:[#allocation5 + $0x188] sm:$0xff] }
 0x2ca   :  { %1258 = vtanh.f32 %v457_v51 }
 0x2d0   :  { %v1259_v42 = vpop.eup %1258 }
 0x2d1   :  { %497 = vmatmul.f32.vlgmr.msra.gmra.mxu3 %v1259_v42  ;;  %v570_v42 = vld [vmem:[#allocation5 + $0x100] sm:$0xff] }
 0x2d2   :  { %744 = vmatpush.msra.mxu3 %v1488_v1  ;;  %v478_v1 = vpop.f32.mrf.mxu2 }
 0x2d4   :  { %745 = vmatpush.msra.mxu3 %v1494_v3 }
 0x2d6   :  { %746 = vmatpush.msra.mxu3 %v1498_v5 }
 0x2d8   :  { %747 = vmatpush.msra.mxu3 %v1514_v11 }
 0x2d9   :  { %678 = vmatmul.f32.vlgmr.msrb.gmra.mxu3 %v344_v25 }
 0x2da   :  { %748 = vmatpush.msra.mxu3 %v1526_v15 }
 0x2dc   :  { %749 = vmatpush.msra.mxu3 %v1538_v19 }
 0x2de   :  { %750 = vmatpush.msra.mxu3 %v1550_v23 }
 0x2e0   :  { %751 = vmatpush.msra.mxu3 %v1562_v27 }
 0x2e2   :  { %752 = vmatpush.msra.mxu3 %v1574_v31 }
 0x2e4   :  { %753 = vmatpush.msra.mxu3 %v1586_v35  ;;  %v585_v35 = vld [vmem:[#allocation5 + $0x178] sm:$0xff] }
 0x2e5   :  { %602 = vmatpush.msrb.mxu0 %v585_v35  ;;  %v2080_v35 = vld [vmem:[#allocation2 + $0xb0] sm:$0xff] }
 0x2e6   :  { %754 = vmatpush.msra.mxu3 %v1598_v39  ;;  %v601_v39 = vld [vmem:[#allocation5 + $0x1f8] sm:$0xff] }
 0x2e7   :  { %622 = vmatpush.msrb.mxu1 %v601_v39  ;;  %v2083_v39 = vld [vmem:[#allocation2 + $0x1b0] sm:$0xff] }
 0x2e8   :  { %755 = vmatpush.msra.mxu3 %v1610_v43  ;;  %v584_v43 = vld [vmem:[#allocation5 + $0x170] sm:$0xff] }
 0x2e9   :  { %603 = vmatpush.msrb.mxu0 %v584_v43  ;;  %v2086_v43 = vld [vmem:[#allocation2 + $0xa0] sm:$0xff] }
 0x2ea   :  { %756 = vmatpush.msra.mxu3 %v1622_v47  ;;  %v600_v47 = vld [vmem:[#allocation5 + $0x1f0] sm:$0xff] }
 0x2eb   :  { %623 = vmatpush.msrb.mxu1 %v600_v47  ;;  %604 = vmatpush.msrb.mxu0 %v583_v29  ;;  %v2089_v47 = vld [vmem:[#allocation2 + $0x1a0] sm:$0xff]  ;;  %v2092_v29 = vld [vmem:[#allocation2 + $0x90] sm:$0xff] }
 0x2ec   :  { %757 = vmatpush.msra.mxu3 %v2421_v9  ;;  %v582_v9 = vld [vmem:[#allocation5 + $0x160] sm:$0xff] }
 0x2ed   :  { %605 = vmatpush.msrb.mxu0 %v582_v9  ;;  %v2098_v9 = vld [vmem:[#allocation2 + $0x80] sm:$0xff] }
 0x2ee   :  { %758 = vmatpush.msra.mxu3 %v2423_v33  ;;  %v581_v33 = vld [vmem:[#allocation5 + $0x158] sm:$0xff] }
 0x2ef   :  { %606 = vmatpush.msrb.mxu0 %v581_v33  ;;  %v2428_v33 = vld [vmem:[#allocation15_spill] sm:$0xff] }
 0x2f0   :  { %759 = vmatpush.msra.mxu3 %v2425_v21  ;;  %v580_v21 = vld [vmem:[#allocation5 + $0x150] sm:$0xff] }
 0x2f1   :  { %607 = vmatpush.msrb.mxu0 %v580_v21  ;;  %v2434_v21 = vld [vmem:[#allocation25_spill] sm:$0xff] }
 0x2f2   :  { %868 = vmatpush.msrb.mxu3 %v1957_v16  ;;  %v599_v16 = vld [vmem:[#allocation5 + $0x1e8] sm:$0xff] }
 0x2f3   :  { %624 = vmatpush.msrb.mxu1 %v599_v16  ;;  %608 = vmatpush.msrb.mxu0 %v579_v54  ;;  %v2095_v16 = vld [vmem:[#allocation2 + $0x190] sm:$0xff]  ;;  %v2436_v54 = vld [vmem:[#allocation27_spill] sm:$0xff] }
 0x2f5   :  { %625 = vmatpush.msrb.mxu1 %v598_v32  ;;  %609 = vmatpush.msrb.mxu0 %v578_v24  ;;  %v2101_v32 = vld [vmem:[#allocation2 + $0x180] sm:$0xff] }
 0x2f6   :  { %v2439_v24 = vld [vmem:[#allocation30_spill] sm:$0xff] }
 0x2f7   :  { %626 = vmatpush.msrb.mxu1 %v597_v20  ;;  %610 = vmatpush.msrb.mxu0 %v577_v7  ;;  %v2441_v7 = vld [vmem:[#allocation32_spill] sm:$0xff] }
 0x2f9   :  { %627 = vmatpush.msrb.mxu1 %v596_v17  ;;  %611 = vmatpush.msrb.mxu0 %v576_v56  ;;  %v2435_v17 = vld [vmem:[#allocation26_spill] sm:$0xff]  ;;  %v2445_v56 = vld [vmem:[#allocation36_spill] sm:$0xff] }
 0x2fb   :  { %628 = vmatpush.msrb.mxu1 %v595_v63  ;;  %612 = vmatpush.msrb.mxu0 %v575_v62  ;;  %v2437_v63 = vld [vmem:[#allocation28_spill] sm:$0xff]  ;;  %v2447_v62 = vld [vmem:[#allocation38_spill] sm:$0xff] }
 0x2fd   :  { %629 = vmatpush.msrb.mxu1 %v594_v61  ;;  %613 = vmatpush.msrb.mxu0 %v574_v59  ;;  %v2440_v61 = vld [vmem:[#allocation31_spill] sm:$0xff]  ;;  %v2451_v59 = vld [vmem:[#allocation42_spill] sm:$0xff] }
 0x2ff   :  { %630 = vmatpush.msrb.mxu1 %v593_v50  ;;  %614 = vmatpush.msrb.mxu0 %v573_v0  ;;  %v2444_v50 = vld [vmem:[#allocation35_spill] sm:$0xff]  ;;  %v2454_v0 = vld [vmem:[#allocation45_spill] sm:$0xff] }
 0x301   :  { %631 = vmatpush.msrb.mxu1 %v592_v57  ;;  %615 = vmatpush.msrb.mxu0 %v572_v18  ;;  %v2446_v57 = vld [vmem:[#allocation37_spill] sm:$0xff]  ;;  %v2459_v18 = vld [vmem:[#allocation50_spill] sm:$0xff] }
 0x303   :  { %632 = vmatpush.msrb.mxu1 %v591_v28  ;;  %616 = vmatpush.msrb.mxu0 %v571_v30  ;;  %v2448_v28 = vld [vmem:[#allocation39_spill] sm:$0xff]  ;;  %v2462_v30 = vld [vmem:[#allocation53_spill] sm:$0xff] }
 0x305   :  { %633 = vmatpush.msrb.mxu1 %v590_v6  ;;  %617 = vmatpush.msrb.mxu0 %v570_v42  ;;  %v2452_v6 = vld [vmem:[#allocation43_spill] sm:$0xff]  ;;  %v1296_v42 = vld [vmem:[#allocation2 + $0x70] sm:$0xff] }
 0x307   :  { %634 = vmatpush.msrb.mxu1 %v589_v2  ;;  %v2455_v2 = vld [vmem:[#allocation46_spill] sm:$0xff] }
 0x309   :  { %635 = vmatpush.msrb.mxu1 %v588_v22  ;;  %v2460_v22 = vld [vmem:[#allocation51_spill] sm:$0xff] }
 0x30b   :  { %636 = vmatpush.msrb.mxu1 %v587_v34  ;;  %v2463_v34 = vld [vmem:[#allocation54_spill] sm:$0xff] }
 0x30d   :  { %637 = vmatpush.msrb.mxu1 %v586_v46  ;;  %v1297_v46 = vld [vmem:[#allocation2 + $0x170] sm:$0xff] }
 0x354   :  { %v498_v3 = vpop.f32.mrf.mxu3 }
 0x355   :  { %v499_v5 = vadd.f32 %v498_v3, %v478_v1  ;;  %v2056_v3 = vld [vmem:[#allocation2 + $0xf0] sm:$0xff] }
 0x357   :  { %v501_v11 = vsel %vm273_vm0, %v499_v5, -inf }
 0x358   :  { %502 = vmax.xlane.f32.xlu1 %v501_v11  ;;  %v2062_v11 = vld [vmem:[#allocation2 + $0xe0] sm:$0xff] }
 0x3cb   :  { %v503_v15 = vpop.xlane.xlu1 %502 }
 0x3cc   :  { %v504_v19 = vsub.f32 %v499_v5, %v503_v15  ;;  %v2059_v5 = vld [vmem:[#allocation2 + $0x1f0] sm:$0xff]  ;;  %v2065_v15 = vld [vmem:[#allocation2 + $0x1e0] sm:$0xff] }
 0x3ce   :  { %v505_v23 = vmul.f32 1.442695, %v504_v19  ;;  %v2068_v19 = vld [vmem:[#allocation2 + $0xd0] sm:$0xff] }
 0x3d0   :  { %1260 = vpow2.f32 %v505_v23  ;;  %v2071_v23 = vld [vmem:[#allocation2 + $0x1d0] sm:$0xff] }
 0x3d6   :  { %v2049_v27 = vpop.eup %1260 }
 0x3d7   :  { %v507_v31 = vsel %vm273_vm0, %v2049_v27, 0.0 }
 0x3d8   :  { %508 = vadd.xlane.f32.xlu1 %v507_v31  ;;  %v2077_v31 = vld [vmem:[#allocation2 + $0x1c0] sm:$0xff] }
 0x44b   :  { %v509_v55 = vpop.xlane.xlu1 %508 }
 0x44c   :  { %1262 = vrcp.f32 %v509_v55  ;;  %v521_v4 = vand.u32 2147483648, %v509_v55  ;;  %v519_v14 = vand.u32 2147483647, %v509_v55  ;;  %vm515_vm6 = vweird.f32 %v509_v55 }
 0x44e   :  { %v522_v38 = vor.u32 1.1754944e-38, %v521_v4  ;;  %vm520_vm8 = vcmp.eq.f32.partialorder %v519_v14, 8.507059e+37  ;;  %v2456_v4 = vld [vmem:[#allocation47_spill] sm:$0xff]  ;;  %v2458_v14 = vld [vmem:[#allocation49_spill] sm:$0xff] }
 0x452   :  { %v1263_v60 = vpop.eup %1262 }
 0x453   :  { %v511_v8 = vmul.f32 %v1263_v60, %v509_v55  ;;  %vm516_vm5 = vweird.f32 %v1263_v60  ;;  %v2438_v55 = vld [vmem:[#allocation29_spill] sm:$0xff] }
 0x454   :  { %vm517_vm7 = vmor %vm515_vm6, %vm516_vm5 }
 0x455   :  { %v512_v58 = vsub.f32 1.0, %v511_v8  ;;  %v2450_v8 = vld [vmem:[#allocation41_spill] sm:$0xff] }
 0x457   :  { %v513_v10 = vmul.f32 %v1263_v60, %v512_v58  ;;  %v2453_v58 = vld [vmem:[#allocation44_spill] sm:$0xff] }
 0x459   :  { %v514_v26 = vadd.f32 %v1263_v60, %v513_v10  ;;  %v2457_v10 = vld [vmem:[#allocation48_spill] sm:$0xff] }
 0x45b   :  { %v518_v51 = vsel %vm517_vm7, %v1263_v60, %v514_v26  ;;  %v2449_v60 = vld [vmem:[#allocation40_spill] sm:$0xff] }
 0x45c   :  { %v523_v25 = vsel %vm520_vm8, %v522_v38, %v518_v51  ;;  %v2461_v26 = vld [vmem:[#allocation52_spill] sm:$0xff]  ;;  %v2464_v38 = vld [vmem:[#allocation55_spill] sm:$0xff] }
 0x45d   :  { %v524_v1 = vmul.f32 %v2049_v27, %v523_v25  ;;  %v2074_v27 = vld [vmem:[#allocation2 + $0xc0] sm:$0xff]  ;;  %v2465_v51 = vld [vmem:[#allocation56_spill] sm:$0xff] }
 0x45e   :  { %v1298_v25 = vld [vmem:[#allocation2 + $0x60] sm:$0xff] }
 0x45f   :  { %1235 = vmatmul.msk.f32.vlgmr.msra.gmra.mxu0 %vm273_vm0, %v524_v1  ;;  %1236 = vmatmul.msk.f32.vlgmr.msra.gmra.mxu1 %vm273_vm0, %v524_v1  ;;  %v1299_v1 = vld [vmem:[#allocation2 + $0x160] sm:$0xff] }
 0x460   :  { %684 = vmatpush.msra.mxu0 %v2056_v3  ;;  %704 = vmatpush.msra.mxu1 %v2059_v5 }
 0x462   :  { %685 = vmatpush.msra.mxu0 %v2062_v11  ;;  %705 = vmatpush.msra.mxu1 %v2065_v15 }
 0x464   :  { %686 = vmatpush.msra.mxu0 %v2068_v19  ;;  %706 = vmatpush.msra.mxu1 %v2071_v23 }
 0x466   :  { %687 = vmatpush.msra.mxu0 %v2074_v27  ;;  %707 = vmatpush.msra.mxu1 %v2077_v31 }
 0x468   :  { %688 = vmatpush.msra.mxu0 %v2080_v35  ;;  %708 = vmatpush.msra.mxu1 %v2083_v39 }
 0x46a   :  { %689 = vmatpush.msra.mxu0 %v2086_v43  ;;  %709 = vmatpush.msra.mxu1 %v2089_v47 }
 0x46c   :  { %690 = vmatpush.msra.mxu0 %v2092_v29  ;;  %710 = vmatpush.msra.mxu1 %v2095_v16 }
 0x46e   :  { %691 = vmatpush.msra.mxu0 %v2098_v9  ;;  %711 = vmatpush.msra.mxu1 %v2101_v32 }
 0x470   :  { %692 = vmatpush.msra.mxu0 %v1590_v36  ;;  %712 = vmatpush.msra.mxu1 %v1592_v37  ;;  %v2429_v36 = vld [vmem:[#allocation16_spill] sm:$0xff]  ;;  %v2430_v37 = vld [vmem:[#allocation21_spill] sm:$0xff] }
 0x472   :  { %693 = vmatpush.msra.mxu0 %v1602_v40  ;;  %713 = vmatpush.msra.mxu1 %v1604_v41  ;;  %v2431_v40 = vld [vmem:[#allocation22_spill] sm:$0xff]  ;;  %v2432_v41 = vld [vmem:[#allocation23_spill] sm:$0xff] }
 0x474   :  { %694 = vmatpush.msra.mxu0 %v1614_v44  ;;  %714 = vmatpush.msra.mxu1 %v1616_v45  ;;  %v2433_v44 = vld [vmem:[#allocation24_spill] sm:$0xff]  ;;  %v2123_v45 = vld [vmem:[%s2303_s0 + $0x20] sm:$0xff] }
 0x475   :  { %740 = vmatmul.f32.vlgmr.msra.gmra.mxu2 %v2123_v45 }
 0x476   :  { %695 = vmatpush.msra.mxu0 %v1626_v48  ;;  %715 = vmatpush.msra.mxu1 %v1628_v49  ;;  %v2128_v48 = vld [vmem:[%s2303_s0 + $0x28] sm:$0xff] }
 0x477   :  { %760 = vmatmul.f32.vlgmr.msra.gmra.mxu3 %v2128_v48 }
 0x478   :  { %696 = vmatpush.msra.mxu0 %v1638_v52  ;;  %716 = vmatpush.msra.mxu1 %v1640_v53 }
 0x47a   :  { %697 = vmatpush.msra.mxu0 %v2428_v33  ;;  %717 = vmatpush.msra.mxu1 %v2429_v36 }
 0x47c   :  { %698 = vmatpush.msra.mxu0 %v2430_v37  ;;  %718 = vmatpush.msra.mxu1 %v2431_v40  ;;  %v1312_v37 = vld [vmem:[%s2305_s2 + $0xf8] sm:$0xff]  ;;  %v1313_v40 = vld [vmem:[%s2305_s2 + $0xf0] sm:$0xff] }
 0x47e   :  { %699 = vmatpush.msra.mxu0 %v2432_v41  ;;  %719 = vmatpush.msra.mxu1 %v2433_v44  ;;  %v1314_v41 = vld [vmem:[%s2305_s2 + $0xe8] sm:$0xff]  ;;  %v1315_v44 = vld [vmem:[%s2305_s2 + $0xe0] sm:$0xff] }
 0x4dc   :  { %v545_v49 = vpop.f32.mrf.mxu0  ;;  %v565_v52 = vpop.f32.mrf.mxu1 }
 0x4dd   :  { %v568_v53 = vmul.f32 %v545_v49, %v1962_v13  ;;  %v569_v20 = vmul.f32 %v565_v52, %v1969_v12  ;;  %v2442_v13 = vld [vmem:[#allocation33_spill] sm:$0xff]  ;;  %v2443_v12 = vld [vmem:[#allocation34_spill] sm:$0xff]  ;;  %v1317_v52 = vld [vmem:[%s2305_s2 + $0xd0] sm:$0xff] }
 0x4de   :  { %v1316_v49 = vld [vmem:[%s2305_s2 + $0xd8] sm:$0xff] }
 0x4df   :  { %618 = vmatmul.f32.vlgmr.msrb.gmra.mxu0 %v568_v53  ;;  %638 = vmatmul.f32.vlgmr.msrb.gmra.mxu1 %v569_v20  ;;  %v1318_v53 = vld [vmem:[%s2305_s2 + $0xc8] sm:$0xff] }
 0x4e0   :  { %766 = vmatpush.msrb.mxu0 %v2434_v21  ;;  %786 = vmatpush.msrb.mxu1 %v2435_v17 }
 0x4e2   :  { %767 = vmatpush.msrb.mxu0 %v2436_v54  ;;  %787 = vmatpush.msrb.mxu1 %v2437_v63  ;;  %v1319_v54 = vld [vmem:[%s2305_s2 + $0xc0] sm:$0xff] }
 0x4e4   :  { %768 = vmatpush.msrb.mxu0 %v2438_v55  ;;  %788 = vmatpush.msrb.mxu1 %v2439_v24 }
 0x4e6   :  { %769 = vmatpush.msrb.mxu0 %v2440_v61  ;;  %789 = vmatpush.msrb.mxu1 %v2441_v7 }
 0x4e7   :  { %700 = vmatmul.f32.vlgmr.msra.gmra.mxu0 %v2123_v45  ;;  %720 = vmatmul.f32.vlgmr.msra.gmra.mxu1 %v2128_v48 }
 0x4e8   :  { %770 = vmatpush.msrb.mxu0 %v2442_v13  ;;  %790 = vmatpush.msrb.mxu1 %v2443_v12  ;;  %v1320_v12 = vld [vmem:[%s2305_s2 + $0x78] sm:$0xff] }
 0x4ea   :  { %771 = vmatpush.msrb.mxu0 %v2444_v50  ;;  %791 = vmatpush.msrb.mxu1 %v2445_v56  ;;  %v1321_v50 = vld [vmem:[%s2305_s2 + $0x70] sm:$0xff]  ;;  %v1322_v56 = vld [vmem:[%s2305_s2 + $0x68] sm:$0xff] }
 0x4ec   :  { %772 = vmatpush.msrb.mxu0 %v2446_v57  ;;  %792 = vmatpush.msrb.mxu1 %v2447_v62  ;;  %v1323_v57 = vld [vmem:[%s2305_s2 + $0x60] sm:$0xff]  ;;  %v1324_v62 = vld [vmem:[%s2305_s2 + $0x58] sm:$0xff] }
 0x4ee   :  { %773 = vmatpush.msrb.mxu0 %v2448_v28  ;;  %793 = vmatpush.msrb.mxu1 %v2449_v60  ;;  %v1325_v28 = vld [vmem:[%s2305_s2 + $0x50] sm:$0xff]  ;;  %v1326_v60 = vld [vmem:[%s2305_s2 + $0x48] sm:$0xff] }
 0x4f0   :  { %774 = vmatpush.msrb.mxu0 %v2450_v8  ;;  %794 = vmatpush.msrb.mxu1 %v2451_v59  ;;  %v1327_v8 = vld [vmem:[%s2305_s2 + $0x40] sm:$0xff] }
 0x4f2   :  { %775 = vmatpush.msrb.mxu0 %v2452_v6  ;;  %795 = vmatpush.msrb.mxu1 %v2453_v58  ;;  %v1329_v6 = vld [vmem:[%s2305_s2 + $0x30] sm:$0xff] }
 0x4f4   :  { %776 = vmatpush.msrb.mxu0 %v2454_v0  ;;  %796 = vmatpush.msrb.mxu1 %v2455_v2 }
 0x4f6   :  { %777 = vmatpush.msrb.mxu0 %v2456_v4  ;;  %797 = vmatpush.msrb.mxu1 %v2457_v10 }
 0x4f8   :  { %778 = vmatpush.msrb.mxu0 %v2458_v14  ;;  %798 = vmatpush.msrb.mxu1 %v2459_v18 }
 0x4fa   :  { %779 = vmatpush.msrb.mxu0 %v2460_v22  ;;  %799 = vmatpush.msrb.mxu1 %v2461_v26 }
 0x4fc   :  { %780 = vmatpush.msrb.mxu0 %v2462_v30  ;;  %800 = vmatpush.msrb.mxu1 %v2463_v34 }
 0x4fe   :  { %781 = vmatpush.msrb.mxu0 %v2464_v38  ;;  %801 = vmatpush.msrb.mxu1 %v2465_v51 }
 0x500   :  { %950 = vmatpush.msra.mxu0 %v2056_v3  ;;  %970 = vmatpush.msra.mxu1 %v2059_v5  ;;  %v1300_v3 = vld [vmem:[#allocation2 + $0x50] sm:$0xff] }
 0x501   :  { %v1301_v5 = vld [vmem:[#allocation2 + $0x150] sm:$0xff] }
 0x502   :  { %951 = vmatpush.msra.mxu0 %v2062_v11  ;;  %971 = vmatpush.msra.mxu1 %v2065_v15  ;;  %v1302_v11 = vld [vmem:[#allocation2 + $0x40] sm:$0xff] }
 0x503   :  { %v1303_v15 = vld [vmem:[#allocation2 + $0x140] sm:$0xff] }
 0x504   :  { %952 = vmatpush.msra.mxu0 %v2068_v19  ;;  %972 = vmatpush.msra.mxu1 %v2071_v23  ;;  %v1304_v19 = vld [vmem:[#allocation2 + $0x30] sm:$0xff] }
 0x505   :  { %v1305_v23 = vld [vmem:[#allocation2 + $0x130] sm:$0xff] }
 0x506   :  { %953 = vmatpush.msra.mxu0 %v2074_v27  ;;  %973 = vmatpush.msra.mxu1 %v2077_v31  ;;  %v1306_v27 = vld [vmem:[#allocation2 + $0x20] sm:$0xff] }
 0x507   :  { %v1307_v31 = vld [vmem:[#allocation2 + $0x120] sm:$0xff] }
 0x508   :  { %954 = vmatpush.msra.mxu0 %v2080_v35  ;;  %974 = vmatpush.msra.mxu1 %v2083_v39  ;;  %v1308_v35 = vld [vmem:[#allocation2 + $0x10] sm:$0xff] }
 0x509   :  { %v1309_v39 = vld [vmem:[#allocation2 + $0x110] sm:$0xff] }
 0x50a   :  { %955 = vmatpush.msra.mxu0 %v2086_v43  ;;  %975 = vmatpush.msra.mxu1 %v2089_v47  ;;  %v1310_v43 = vld [vmem:[#allocation2] sm:$0xff] }
 0x50b   :  { %v1311_v47 = vld [vmem:[#allocation2 + $0x100] sm:$0xff] }
 0x50c   :  { %956 = vmatpush.msra.mxu0 %v2092_v29  ;;  %976 = vmatpush.msra.mxu1 %v2095_v16  ;;  %v659_v29 = vpop.f32.mrf.mxu2  ;;  %v679_v16 = vpop.f32.mrf.mxu3 }
 0x50e   :  { %957 = vmatpush.msra.mxu0 %v2098_v9  ;;  %977 = vmatpush.msra.mxu1 %v2101_v32 }
 0x510   :  { %958 = vmatpush.msra.mxu0 %v1296_v42  ;;  %978 = vmatpush.msra.mxu1 %v1297_v46  ;;  %v888_v46 = vld [vmem:[#allocation5 + $0x268] sm:$0xff] }
 0x512   :  { %959 = vmatpush.msra.mxu0 %v1298_v25  ;;  %979 = vmatpush.msra.mxu1 %v1299_v1  ;;  %v904_v25 = vld [vmem:[#allocation5 + $0x2e8] sm:$0xff]  ;;  %v887_v1 = vld [vmem:[#allocation5 + $0x260] sm:$0xff] }
 0x514   :  { %960 = vmatpush.msra.mxu0 %v1300_v3  ;;  %980 = vmatpush.msra.mxu1 %v1301_v5  ;;  %v741_v9 = vpop.f32.mrf.mxu2  ;;  %v761_v32 = vpop.f32.mrf.mxu3  ;;  %v903_v3 = vld [vmem:[#allocation5 + $0x2e0] sm:$0xff]  ;;  %v886_v5 = vld [vmem:[#allocation5 + $0x258] sm:$0xff] }
 0x515   :  { %v762_v33 = vadd.f32 %v761_v32, %v741_v9  ;;  %v880_v9 = vld [vmem:[#allocation5 + $0x228] sm:$0xff] }
 0x516   :  { %961 = vmatpush.msra.mxu0 %v1302_v11  ;;  %981 = vmatpush.msra.mxu1 %v1303_v15  ;;  %v902_v11 = vld [vmem:[#allocation5 + $0x2d8] sm:$0xff]  ;;  %v885_v15 = vld [vmem:[#allocation5 + $0x250] sm:$0xff]  ;;  %v896_v32 = vld [vmem:[#allocation5 + $0x2a8] sm:$0xff] }
 0x517   :  { %1264 = vtanh.f32 %v762_v33 }
 0x518   :  { %962 = vmatpush.msra.mxu0 %v1304_v19  ;;  %982 = vmatpush.msra.mxu1 %v1305_v23  ;;  %v901_v19 = vld [vmem:[#allocation5 + $0x2d0] sm:$0xff]  ;;  %v884_v23 = vld [vmem:[#allocation5 + $0x248] sm:$0xff] }
 0x51a   :  { %963 = vmatpush.msra.mxu0 %v1306_v27  ;;  %983 = vmatpush.msra.mxu1 %v1307_v31  ;;  %v900_v27 = vld [vmem:[#allocation5 + $0x2c8] sm:$0xff] }
 0x51c   :  { %964 = vmatpush.msra.mxu0 %v1308_v35  ;;  %984 = vmatpush.msra.mxu1 %v1309_v39  ;;  %v883_v35 = vld [vmem:[#allocation5 + $0x240] sm:$0xff] }
 0x51d   :  { %v1265_v36 = vpop.eup %1264  ;;  %v899_v39 = vld [vmem:[#allocation5 + $0x2c0] sm:$0xff] }
 0x51e   :  { %965 = vmatpush.msra.mxu0 %v1310_v43  ;;  %985 = vmatpush.msra.mxu1 %v1311_v47  ;;  %v882_v43 = vld [vmem:[#allocation5 + $0x238] sm:$0xff] }
 0x51f   :  { %802 = vmatmul.f32.vlgmr.msrb.gmra.mxu1 %v1265_v36  ;;  %v898_v47 = vld [vmem:[#allocation5 + $0x2b8] sm:$0xff] }
 0x520   :  { %1052 = vmatpush.msrb.mxu1 %v1312_v37  ;;  %v879_v37 = vld [vmem:[#allocation5 + $0x220] sm:$0xff] }
 0x522   :  { %1053 = vmatpush.msrb.mxu1 %v1313_v40  ;;  %v895_v40 = vld [vmem:[#allocation5 + $0x2a0] sm:$0xff] }
 0x524   :  { %1054 = vmatpush.msrb.mxu1 %v1314_v41 }
 0x526   :  { %1055 = vmatpush.msrb.mxu1 %v1315_v44  ;;  %v878_v44 = vld [vmem:[#allocation5 + $0x218] sm:$0xff] }
 0x528   :  { %1056 = vmatpush.msrb.mxu1 %v1316_v49  ;;  %v894_v49 = vld [vmem:[#allocation5 + $0x298] sm:$0xff] }
 0x52a   :  { %1057 = vmatpush.msrb.mxu1 %v1317_v52 }
 0x52c   :  { %1058 = vmatpush.msrb.mxu1 %v1318_v53 }
 0x52e   :  { %1059 = vmatpush.msrb.mxu1 %v1319_v54 }
 0x530   :  { %1060 = vmatpush.msrb.mxu1 %v2451_v59  ;;  %v1328_v59 = vld [vmem:[%s2305_s2 + $0x38] sm:$0xff] }
 0x532   :  { %1061 = vmatpush.msrb.mxu1 %v2453_v58  ;;  %v1330_v58 = vld [vmem:[%s2305_s2 + $0x28] sm:$0xff] }
 0x534   :  { %1062 = vmatpush.msrb.mxu1 %v2455_v2 }
 0x536   :  { %1063 = vmatpush.msrb.mxu1 %v2457_v10 }
 0x538   :  { %1064 = vmatpush.msrb.mxu1 %v2459_v18 }
 0x53a   :  { %1065 = vmatpush.msrb.mxu1 %v2461_v26 }
 0x53c   :  { %1066 = vmatpush.msrb.mxu1 %v2463_v34 }
 0x53e   :  { %1067 = vmatpush.msrb.mxu1 %v2465_v51 }
 0x55c   :  { %v619_v20 = vpop.f32.mrf.mxu0  ;;  %v639_v21 = vpop.f32.mrf.mxu1 }
 0x55d   :  { %v640_v17 = vadd.f32 %v639_v21, %v619_v20  ;;  %v877_v21 = vld [vmem:[#allocation5 + $0x210] sm:$0xff] }
 0x55f   :  { %v660_v63 = vadd.f32 %v659_v29, %v640_v17  ;;  %v881_v29 = vld [vmem:[#allocation5 + $0x230] sm:$0xff] }
 0x560   :  { %v893_v17 = vld [vmem:[#allocation5 + $0x290] sm:$0xff] }
 0x561   :  { %v2209_v55 = vadd.f32 %v679_v16, %v660_v63  ;;  %v897_v16 = vld [vmem:[#allocation5 + $0x2b0] sm:$0xff]  ;;  %v876_v63 = vld [vmem:[#allocation5 + $0x208] sm:$0xff] }
 0x564   :  { %v701_v24 = vpop.f32.mrf.mxu0  ;;  %v721_v61 = vpop.f32.mrf.mxu1 }
 0x565   :  { %v722_v7 = vadd.f32 %v721_v61, %v701_v24  ;;  %v892_v24 = vld [vmem:[#allocation5 + $0x288] sm:$0xff] }
 0x567   :  { %1266 = vtanh.f32 %v722_v7 }
 0x56d   :  { %v1267_v13 = vpop.eup %1266 }
 0x56e   :  { %782 = vmatmul.f32.vlgmr.msrb.gmra.mxu0 %v1267_v13  ;;  %v875_v13 = vld [vmem:[#allocation5 + $0x200] sm:$0xff] }
 0x56f   :  { %1032 = vmatpush.msrb.mxu0 %v1320_v12  ;;  %v891_v12 = vld [vmem:[#allocation5 + $0x280] sm:$0xff] }
 0x571   :  { %1033 = vmatpush.msrb.mxu0 %v1321_v50 }
 0x573   :  { %1034 = vmatpush.msrb.mxu0 %v1322_v56 }
 0x575   :  { %1035 = vmatpush.msrb.mxu0 %v1323_v57  ;;  %v1331_v57 = vld [vmem:[#allocation2 + $0xf8] sm:$0xff] }
 0x577   :  { %1036 = vmatpush.msrb.mxu0 %v1324_v62  ;;  %v1332_v62 = vld [vmem:[#allocation2 + $0x1f8] sm:$0xff] }
 0x579   :  { %1037 = vmatpush.msrb.mxu0 %v1325_v28  ;;  %v1333_v28 = vld [vmem:[#allocation2 + $0xe8] sm:$0xff] }
 0x57b   :  { %1038 = vmatpush.msrb.mxu0 %v1326_v60  ;;  %v1334_v60 = vld [vmem:[#allocation2 + $0x1e8] sm:$0xff] }
 0x57d   :  { %1039 = vmatpush.msrb.mxu0 %v1327_v8  ;;  %v1335_v8 = vld [vmem:[#allocation2 + $0xd8] sm:$0xff] }
 0x57f   :  { %1040 = vmatpush.msrb.mxu0 %v1328_v59  ;;  %v1336_v59 = vld [vmem:[#allocation2 + $0x1d8] sm:$0xff] }
 0x581   :  { %1041 = vmatpush.msrb.mxu0 %v1329_v6  ;;  %v1337_v6 = vld [vmem:[#allocation2 + $0xc8] sm:$0xff] }
 0x583   :  { %1042 = vmatpush.msrb.mxu0 %v1330_v58  ;;  %v1338_v58 = vld [vmem:[#allocation2 + $0x1c8] sm:$0xff] }
 0x585   :  { %1043 = vmatpush.msrb.mxu0 %v2456_v4 }
 0x587   :  { %1044 = vmatpush.msrb.mxu0 %v2458_v14  ;;  %v890_v14 = vld [vmem:[#allocation5 + $0x278] sm:$0xff] }
 0x588   :  { %907 = vmatpush.msra.mxu2 %v890_v14  ;;  %v1348_v14 = vld [vmem:[#allocation2 + $0x178] sm:$0xff] }
 0x589   :  { %1045 = vmatpush.msrb.mxu0 %v2460_v22  ;;  %v906_v22 = vld [vmem:[#allocation5 + $0x2f8] sm:$0xff] }
 0x58a   :  { %927 = vmatpush.msra.mxu3 %v906_v22  ;;  %v1349_v22 = vld [vmem:[#allocation2 + $0x68] sm:$0xff] }
 0x58b   :  { %1046 = vmatpush.msrb.mxu0 %v2462_v30  ;;  %v889_v30 = vld [vmem:[#allocation5 + $0x270] sm:$0xff] }
 0x58c   :  { %908 = vmatpush.msra.mxu2 %v889_v30  ;;  %v1350_v30 = vld [vmem:[#allocation2 + $0x168] sm:$0xff] }
 0x58d   :  { %1047 = vmatpush.msrb.mxu0 %v2464_v38  ;;  %v905_v38 = vld [vmem:[#allocation5 + $0x2f0] sm:$0xff] }
 0x58e   :  { %928 = vmatpush.msra.mxu3 %v905_v38  ;;  %909 = vmatpush.msra.mxu2 %v888_v46  ;;  %v1351_v38 = vld [vmem:[#allocation2 + $0x58] sm:$0xff] }
 0x58f   :  { %v1352_v46 = vld [vmem:[#allocation2 + $0x158] sm:$0xff] }
 0x590   :  { %929 = vmatpush.msra.mxu3 %v904_v25  ;;  %910 = vmatpush.msra.mxu2 %v887_v1  ;;  %v1353_v25 = vld [vmem:[#allocation2 + $0x48] sm:$0xff] }
 0x591   :  { %v1354_v1 = vld [vmem:[#allocation2 + $0x148] sm:$0xff] }
 0x592   :  { %930 = vmatpush.msra.mxu3 %v903_v3  ;;  %911 = vmatpush.msra.mxu2 %v886_v5  ;;  %v1355_v3 = vld [vmem:[#allocation2 + $0x38] sm:$0xff] }
 0x593   :  { %v1356_v5 = vld [vmem:[#allocation2 + $0x138] sm:$0xff] }
 0x594   :  { %931 = vmatpush.msra.mxu3 %v902_v11  ;;  %912 = vmatpush.msra.mxu2 %v885_v15  ;;  %v1357_v11 = vld [vmem:[#allocation2 + $0x28] sm:$0xff] }
 0x595   :  { %v1358_v15 = vld [vmem:[#allocation2 + $0x128] sm:$0xff] }
 0x596   :  { %932 = vmatpush.msra.mxu3 %v901_v19  ;;  %913 = vmatpush.msra.mxu2 %v884_v23  ;;  %v1359_v19 = vld [vmem:[#allocation2 + $0x18] sm:$0xff] }
 0x597   :  { %v1360_v23 = vld [vmem:[#allocation2 + $0x118] sm:$0xff] }
 0x598   :  { %933 = vmatpush.msra.mxu3 %v900_v27  ;;  %914 = vmatpush.msra.mxu2 %v883_v35  ;;  %v1361_v27 = vld [vmem:[#allocation2 + $0x8] sm:$0xff]  ;;  %v2267_v35 = vld [vmem:[%s2303_s0 + $0x30] sm:$0xff] }
 0x599   :  { %966 = vmatmul.f32.vlgmr.msra.gmra.mxu0 %v2267_v35 }
 0x59a   :  { %934 = vmatpush.msra.mxu3 %v899_v39  ;;  %915 = vmatpush.msra.mxu2 %v882_v43  ;;  %v2273_v39 = vld [vmem:[%s2303_s0 + $0x38] sm:$0xff]  ;;  %s1449_s0 = smov [#allocation7]  }
 0x59b   :  { %986 = vmatmul.f32.vlgmr.msra.gmra.mxu1 %v2273_v39 }
 0x59c   :  { %v803_v0 = vpop.f32.mrf.mxu1  ;;  %935 = vmatpush.msra.mxu3 %v898_v47  ;;  %916 = vmatpush.msra.mxu2 %v881_v29 }
 0x59e   :  { %936 = vmatpush.msra.mxu3 %v897_v16  ;;  %917 = vmatpush.msra.mxu2 %v880_v9  ;;  %v1363_v9 = vld [vmem:[%s2306_s3] sm:$0xff] }
 0x5a0   :  { %937 = vmatpush.msra.mxu3 %v896_v32  ;;  %918 = vmatpush.msra.mxu2 %v879_v37  ;;  %v1364_v32 = vld [vmem:[%s2306_s3 + $0x8] sm:$0xff]  ;;  %s1220_s3 = sshll.u32 %s1449_s0, 4  ;;  %s1221_s3 = int_to_ptr.vmem [resolvable:$true] %s1220_s3 }
 0x5a2   :  { %938 = vmatpush.msra.mxu3 %v895_v40  ;;  %919 = vmatpush.msra.mxu2 %v878_v44 }
 0x5a4   :  { %939 = vmatpush.msra.mxu3 %v894_v49  ;;  %920 = vmatpush.msra.mxu2 %v877_v21 }
 0x5a6   :  { %940 = vmatpush.msra.mxu3 %v893_v17  ;;  %921 = vmatpush.msra.mxu2 %v876_v63 }
 0x5a8   :  { %941 = vmatpush.msra.mxu3 %v892_v24  ;;  %922 = vmatpush.msra.mxu2 %v875_v13 }
 0x5aa   :  { %942 = vmatpush.msra.mxu3 %v891_v12  ;;  %v1156_v12 = vld [vmem:[#allocation5 + $0x378] sm:$0xff] }
 0x5eb   :  { %v783_v2 = vpop.f32.mrf.mxu0 }
 0x5ec   :  { %v804_v10 = vadd.f32 %v803_v0, %v783_v2  ;;  %v1339_v0 = vld [vmem:[#allocation2 + $0xb8] sm:$0xff] }
 0x5ed   :  { %v1340_v2 = vld [vmem:[#allocation2 + $0x1b8] sm:$0xff] }
 0x5ee   :  { %v806_v18 = vsel %vm273_vm0, %v804_v10, -inf }
 0x5ef   :  { %807 = vmax.xlane.f32.xlu2 %v806_v18  ;;  %v1342_v18 = vld [vmem:[#allocation2 + $0x1a8] sm:$0xff] }
 0x662   :  { %v808_v26 = vpop.xlane.xlu2 %807 }
 0x663   :  { %v809_v34 = vsub.f32 %v804_v10, %v808_v26  ;;  %v1341_v10 = vld [vmem:[#allocation2 + $0xa8] sm:$0xff]  ;;  %v1343_v26 = vld [vmem:[#allocation2 + $0x98] sm:$0xff] }
 0x665   :  { %v810_v51 = vmul.f32 1.442695, %v809_v34  ;;  %v1344_v34 = vld [vmem:[#allocation2 + $0x198] sm:$0xff] }
 0x667   :  { %1268 = vpow2.f32 %v810_v51  ;;  %v1345_v51 = vld [vmem:[#allocation2 + $0x88] sm:$0xff] }
 0x66d   :  { %v2257_v42 = vpop.eup %1268 }
 0x66e   :  { %v812_v4 = vsel %vm273_vm0, %v2257_v42, 0.0 }
 0x66f   :  { %813 = vadd.xlane.f32.xlu2 %v812_v4  ;;  %v1347_v4 = vld [vmem:[#allocation2 + $0x78] sm:$0xff] }
 0x6e2   :  { %v814_v31 = vpop.xlane.xlu2 %813 }
 0x6e3   :  { %1270 = vrcp.f32 %v814_v31  ;;  %v826_v52 = vand.u32 2147483648, %v814_v31  ;;  %v824_v20 = vand.u32 2147483647, %v814_v31  ;;  %vm820_vm10 = vweird.f32 %v814_v31 }
 0x6e5   :  { %v827_v61 = vor.u32 1.1754944e-38, %v826_v52  ;;  %vm825_vm12 = vcmp.eq.f32.partialorder %v824_v20, 8.507059e+37 }
 0x6e9   :  { %v1271_v33 = vpop.eup %1270 }
 0x6ea   :  { %v816_v36 = vmul.f32 %v1271_v33, %v814_v31  ;;  %vm821_vm9 = vweird.f32 %v1271_v33  ;;  %v1362_v31 = vld [vmem:[#allocation2 + $0x108] sm:$0xff] }
 0x6eb   :  { %vm822_vm11 = vmor %vm820_vm10, %vm821_vm9 }
 0x6ec   :  { %v817_v41 = vsub.f32 1.0, %v816_v36 }
 0x6ee   :  { %v818_v53 = vmul.f32 %v1271_v33, %v817_v41 }
 0x6f0   :  { %v819_v54 = vadd.f32 %v1271_v33, %v818_v53 }
 0x6f2   :  { %v823_v7 = vsel %vm822_vm11, %v1271_v33, %v819_v54  ;;  %v967_v33 = vpop.f32.mrf.mxu0 }
 0x6f3   :  { %v828_v50 = vsel %vm825_vm12, %v827_v61, %v823_v7 }
 0x6f4   :  { %v829_v56 = vmul.f32 %v2257_v42, %v828_v50  ;;  %v1346_v42 = vld [vmem:[#allocation2 + $0x188] sm:$0xff]  ;;  %v1172_v50 = vld [vmem:[#allocation5 + $0x3f8] sm:$0xff] }
 0x6f6   :  { %1237 = vmatmul.msk.f32.vlgmr.msrb.gmra.mxu2 %vm273_vm0, %v829_v56  ;;  %1238 = vmatmul.msk.f32.vlgmr.msrb.gmra.mxu3 %vm273_vm0, %v829_v56  ;;  %v1155_v56 = vld [vmem:[#allocation5 + $0x370] sm:$0xff] }
 0x6f7   :  { %990 = vmatpush.msrb.mxu2 %v1331_v57  ;;  %1010 = vmatpush.msrb.mxu3 %v1332_v62  ;;  %v1171_v57 = vld [vmem:[#allocation5 + $0x3f0] sm:$0xff]  ;;  %v1154_v62 = vld [vmem:[#allocation5 + $0x368] sm:$0xff] }
 0x6f9   :  { %991 = vmatpush.msrb.mxu2 %v1333_v28  ;;  %1011 = vmatpush.msrb.mxu3 %v1334_v60  ;;  %v1170_v28 = vld [vmem:[#allocation5 + $0x3e8] sm:$0xff]  ;;  %v1153_v60 = vld [vmem:[#allocation5 + $0x360] sm:$0xff] }
 0x6fb   :  { %992 = vmatpush.msrb.mxu2 %v1335_v8  ;;  %1012 = vmatpush.msrb.mxu3 %v1336_v59  ;;  %v1169_v8 = vld [vmem:[#allocation5 + $0x3e0] sm:$0xff]  ;;  %v1152_v59 = vld [vmem:[#allocation5 + $0x358] sm:$0xff] }
 0x6fd   :  { %993 = vmatpush.msrb.mxu2 %v1337_v6  ;;  %1013 = vmatpush.msrb.mxu3 %v1338_v58  ;;  %v1168_v6 = vld [vmem:[#allocation5 + $0x3d8] sm:$0xff]  ;;  %v1151_v58 = vld [vmem:[#allocation5 + $0x350] sm:$0xff] }
 0x6ff   :  { %994 = vmatpush.msrb.mxu2 %v1339_v0  ;;  %1014 = vmatpush.msrb.mxu3 %v1340_v2  ;;  %v1167_v0 = vld [vmem:[#allocation5 + $0x3d0] sm:$0xff]  ;;  %v1150_v2 = vld [vmem:[#allocation5 + $0x348] sm:$0xff] }
 0x701   :  { %995 = vmatpush.msrb.mxu2 %v1341_v10  ;;  %1015 = vmatpush.msrb.mxu3 %v1342_v18  ;;  %v1166_v10 = vld [vmem:[#allocation5 + $0x3c8] sm:$0xff] }
 0x703   :  { %996 = vmatpush.msrb.mxu2 %v1343_v26  ;;  %1016 = vmatpush.msrb.mxu3 %v1344_v34  ;;  %v1149_v26 = vld [vmem:[#allocation5 + $0x340] sm:$0xff] }
 0x704   :  { %v1165_v34 = vld [vmem:[#allocation5 + $0x3c0] sm:$0xff] }
 0x705   :  { %997 = vmatpush.msrb.mxu2 %v1345_v51  ;;  %1017 = vmatpush.msrb.mxu3 %v1346_v42  ;;  %v1148_v51 = vld [vmem:[#allocation5 + $0x338] sm:$0xff] }
 0x706   :  { %v1164_v42 = vld [vmem:[#allocation5 + $0x3b8] sm:$0xff] }
 0x707   :  { %998 = vmatpush.msrb.mxu2 %v1347_v4  ;;  %1018 = vmatpush.msrb.mxu3 %v1348_v14  ;;  %v1147_v4 = vld [vmem:[#allocation5 + $0x330] sm:$0xff] }
 0x708   :  { %v1163_v14 = vld [vmem:[#allocation5 + $0x3b0] sm:$0xff] }
 0x709   :  { %999 = vmatpush.msrb.mxu2 %v1349_v22  ;;  %1019 = vmatpush.msrb.mxu3 %v1350_v30  ;;  %v1146_v22 = vld [vmem:[#allocation5 + $0x328] sm:$0xff] }
 0x70a   :  { %v1162_v30 = vld [vmem:[#allocation5 + $0x3a8] sm:$0xff] }
 0x70b   :  { %1000 = vmatpush.msrb.mxu2 %v1351_v38  ;;  %1020 = vmatpush.msrb.mxu3 %v1352_v46 }
 0x70d   :  { %1001 = vmatpush.msrb.mxu2 %v1353_v25  ;;  %1021 = vmatpush.msrb.mxu3 %v1354_v1  ;;  %v1145_v25 = vld [vmem:[#allocation5 + $0x320] sm:$0xff] }
 0x70e   :  { %v1161_v1 = vld [vmem:[#allocation5 + $0x3a0] sm:$0xff] }
 0x70f   :  { %1002 = vmatpush.msrb.mxu2 %v1355_v3  ;;  %1022 = vmatpush.msrb.mxu3 %v1356_v5  ;;  %v1144_v5 = vld [vmem:[#allocation5 + $0x318] sm:$0xff] }
 0x711   :  { %1003 = vmatpush.msrb.mxu2 %v1357_v11  ;;  %1023 = vmatpush.msrb.mxu3 %v1358_v15  ;;  %v1160_v11 = vld [vmem:[#allocation5 + $0x398] sm:$0xff] }
 0x713   :  { %1004 = vmatpush.msrb.mxu2 %v1359_v19  ;;  %1024 = vmatpush.msrb.mxu3 %v1360_v23 }
 0x715   :  { %1005 = vmatpush.msrb.mxu2 %v1361_v27  ;;  %1025 = vmatpush.msrb.mxu3 %v1362_v31  ;;  %v1143_v27 = vld [vmem:[#allocation5 + $0x310] sm:$0xff] }
 0x716   :  { %v1159_v31 = vld [vmem:[#allocation5 + $0x390] sm:$0xff] }
 0x779   :  { %v850_v43 = vpop.f32.mrf.mxu2  ;;  %v870_v47 = vpop.f32.mrf.mxu3 }
 0x77a   :  { %v873_v29 = vmul.f32 %v850_v43, %v2123_v45  ;;  %v874_v16 = vmul.f32 %v870_v47, %v2128_v48  ;;  %v987_v45 = vpop.f32.mrf.mxu1 }
 0x77b   :  { %v988_v36 = vadd.f32 %v987_v45, %v967_v33  ;;  %v1158_v33 = vld [vmem:[#allocation5 + $0x388] sm:$0xff]  ;;  %v1141_v45 = vld [vmem:[#allocation5 + $0x300] sm:$0xff] }
 0x77c   :  { %923 = vmatmul.f32.vlgmr.msra.gmra.mxu2 %v873_v29  ;;  %943 = vmatmul.f32.vlgmr.msra.gmra.mxu3 %v874_v16 }
 0x77d   :  { %1114 = vmatpush.msra.mxu2 %v1363_v9  ;;  %1134 = vmatpush.msra.mxu3 %v1364_v32  ;;  %1272 = vtanh.f32 %v988_v36  ;;  %v1142_v32 = vld [vmem:[#allocation5 + $0x308] sm:$0xff]  ;;  %v1157_v36 = vld [vmem:[#allocation5 + $0x380] sm:$0xff] }
 0x783   :  { %v1273_v48 = vpop.eup %1272 }
 0x784   :  { %1006 = vmatmul.f32.vlgmr.msrb.gmra.mxu2 %v2267_v35  ;;  %1026 = vmatmul.f32.vlgmr.msrb.gmra.mxu3 %v2273_v39 }
 0x785   :  { %1048 = vmatmul.f32.vlgmr.msrb.gmra.mxu0 %v1273_v48  ;;  %1173 = vmatpush.msrb.mxu2 %v1156_v12 }
 0x786   :  { %1193 = vmatpush.msrb.mxu3 %v1172_v50 }
 0x787   :  { %1174 = vmatpush.msrb.mxu2 %v1155_v56 }
 0x788   :  { %1194 = vmatpush.msrb.mxu3 %v1171_v57 }
 0x789   :  { %1175 = vmatpush.msrb.mxu2 %v1154_v62 }
 0x78a   :  { %1195 = vmatpush.msrb.mxu3 %v1170_v28 }
 0x78b   :  { %1176 = vmatpush.msrb.mxu2 %v1153_v60 }
 0x78c   :  { %1196 = vmatpush.msrb.mxu3 %v1169_v8 }
 0x78d   :  { %1177 = vmatpush.msrb.mxu2 %v1152_v59 }
 0x78e   :  { %1197 = vmatpush.msrb.mxu3 %v1168_v6 }
 0x78f   :  { %1178 = vmatpush.msrb.mxu2 %v1151_v58 }
 0x790   :  { %1198 = vmatpush.msrb.mxu3 %v1167_v0 }
 0x791   :  { %1179 = vmatpush.msrb.mxu2 %v1150_v2 }
 0x792   :  { %1199 = vmatpush.msrb.mxu3 %v1166_v10 }
 0x793   :  { %1180 = vmatpush.msrb.mxu2 %v1149_v26 }
 0x794   :  { %1200 = vmatpush.msrb.mxu3 %v1165_v34 }
 0x795   :  { %1181 = vmatpush.msrb.mxu2 %v1148_v51 }
 0x796   :  { %1201 = vmatpush.msrb.mxu3 %v1164_v42 }
 0x797   :  { %1182 = vmatpush.msrb.mxu2 %v1147_v4 }
 0x798   :  { %1202 = vmatpush.msrb.mxu3 %v1163_v14 }
 0x799   :  { %1183 = vmatpush.msrb.mxu2 %v1146_v22 }
 0x79a   :  { %1203 = vmatpush.msrb.mxu3 %v1162_v30 }
 0x79b   :  { %1184 = vmatpush.msrb.mxu2 %v1145_v25 }
 0x79c   :  { %1204 = vmatpush.msrb.mxu3 %v1161_v1 }
 0x79d   :  { %1185 = vmatpush.msrb.mxu2 %v1144_v5 }
 0x79e   :  { %1205 = vmatpush.msrb.mxu3 %v1160_v11 }
 0x79f   :  { %1186 = vmatpush.msrb.mxu2 %v1143_v27 }
 0x7a0   :  { %1206 = vmatpush.msrb.mxu3 %v1159_v31 }
 0x7a1   :  { %1187 = vmatpush.msrb.mxu2 %v1142_v32 }
 0x7a2   :  { %1207 = vmatpush.msrb.mxu3 %v1158_v33 }
 0x7a3   :  { %1188 = vmatpush.msrb.mxu2 %v1141_v45 }
 0x7a4   :  { %1208 = vmatpush.msrb.mxu3 %v1157_v36 }
 0x7ff   :  { %v924_v37 = vpop.f32.mrf.mxu2  ;;  %v944_v40 = vpop.f32.mrf.mxu3 }
 0x800   :  { %v945_v41 = vadd.f32 %v944_v40, %v924_v37 }
 0x802   :  { %v2287_v44 = vadd.f32 %v945_v41, %v2209_v55  ;;  %v1049_v21 = vpop.f32.mrf.mxu0 }
 0x807   :  { %v1007_v49 = vpop.f32.mrf.mxu2  ;;  %v1027_v52 = vpop.f32.mrf.mxu3 }
 0x808   :  { %v1028_v53 = vadd.f32 %v1027_v52, %v1007_v49 }
 0x80a   :  { %1274 = vtanh.f32 %v1028_v53 }
 0x810   :  { %v1275_v20 = vpop.eup %1274 }
 0x811   :  { %1068 = vmatmul.f32.vlgmr.msrb.gmra.mxu1 %v1275_v20 }
 0x88e   :  { %v1069_v17 = vpop.f32.mrf.mxu1 }
 0x88f   :  { %v1070_v54 = vadd.f32 %v1069_v17, %v1049_v21 }
 0x891   :  { %v1072_v63 = vsel %vm273_vm0, %v1070_v54, -inf }
 0x892   :  { %1073 = vmax.xlane.f32.xlu0 %v1072_v63 }
 0x905   :  { %v1074_v24 = vpop.xlane.xlu0 %1073 }
 0x906   :  { %v1075_v61 = vsub.f32 %v1070_v54, %v1074_v24 }
 0x908   :  { %v1076_v7 = vmul.f32 1.442695, %v1075_v61 }
 0x90a   :  { %1276 = vpow2.f32 %v1076_v7 }
 0x910   :  { %v2290_v13 = vpop.eup %1276 }
 0x911   :  { %v1078_v55 = vsel %vm273_vm0, %v2290_v13, 0.0 }
 0x912   :  { %1079 = vadd.xlane.f32.xlu1 %v1078_v55 }
 0x985   :  { %v1080_v18 = vpop.xlane.xlu1 %1079 }
 0x986   :  { %1278 = vrcp.f32 %v1080_v18  ;;  %v1092_v15 = vand.u32 2147483648, %v1080_v18  ;;  %v1090_v23 = vand.u32 2147483647, %v1080_v18  ;;  %vm1086_vm14 = vweird.f32 %v1080_v18 }
 0x988   :  { %v1093_v47 = vor.u32 1.1754944e-38, %v1092_v15  ;;  %vm1091_vm1 = vcmp.eq.f32.partialorder %v1090_v23, 8.507059e+37 }
 0x98c   :  { %v1279_v38 = vpop.eup %1278 }
 0x98d   :  { %v1082_v46 = vmul.f32 %v1279_v38, %v1080_v18  ;;  %vm1087_vm13 = vweird.f32 %v1279_v38 }
 0x98e   :  { %vm1088_vm15 = vmor %vm1086_vm14, %vm1087_vm13 }
 0x98f   :  { %v1083_v3 = vsub.f32 1.0, %v1082_v46 }
 0x991   :  { %v1084_v19 = vmul.f32 %v1279_v38, %v1083_v3 }
 0x993   :  { %v1085_v43 = vadd.f32 %v1279_v38, %v1084_v19 }
 0x995   :  { %v1089_v29 = vsel %vm1088_vm15, %v1279_v38, %v1085_v43 }
 0x996   :  { %v1094_v16 = vsel %vm1091_vm1, %v1093_v47, %v1089_v29 }
 0x997   :  { %v1095_v9 = vmul.f32 %v2290_v13, %v1094_v16 }
 0x999   :  { %1239 = vmatmul.msk.f32.vlgmr.msra.gmra.mxu2 %vm273_vm0, %v1095_v9  ;;  %1240 = vmatmul.msk.f32.vlgmr.msra.gmra.mxu3 %vm273_vm0, %v1095_v9 }
 0xa1c   :  { %v1116_v48 = vpop.f32.mrf.mxu2  ;;  %v1136_v37 = vpop.f32.mrf.mxu3 }
 0xa1d   :  { %v1139_v40 = vmul.f32 %v1116_v48, %v2267_v35  ;;  %v1140_v41 = vmul.f32 %v1136_v37, %v2273_v39 }
 0xa1f   :  { %1189 = vmatmul.f32.vlgmr.msrb.gmra.mxu2 %v1139_v40  ;;  %1209 = vmatmul.f32.vlgmr.msrb.gmra.mxu3 %v1140_v41 }
 0xaa2   :  { %v1190_v49 = vpop.f32.mrf.mxu2  ;;  %v1210_v52 = vpop.f32.mrf.mxu3 }
 0xaa3   :  { %v1211_v53 = vadd.f32 %v1210_v52, %v1190_v49 }
 0xaa5   :  { %v1213_v20 = vadd.f32 %v1211_v53, %v2287_v44 }
 0xaa7   :  { %1214 = vst [vmem:[#allocation7] sm:$0xff] %v1213_v20 }
 0xaa8   :  { %1225 = dma.vmem_to_hbm [thread:$0]  %s1221_s3, 128, %s1223_s24, [#allocation4]  }
 0xaa9   :  { %1441 = dma.done.wait [#allocation4], 128  }
 0xaaa   :  { %1442 = vsyncadd [#allocation4], 4294967168 }
 0xaab   :  { %1230 = vsyncpa [#allocation3], 1 }
 0xaac   :  { %1231 = vsyncpa [#allocation6], 1 }
 0xaad   :  { %1232 = vsyncpa [#allocation4], 1 }

</bundles_post_ra>
